<compile_context>
chip_gen: v7x
topology: tpu7x:2x2x1
jax: 0.10.0
libtpu: 0.0.40
codegen_flags: <defaults>
</compile_context>

<pallas_src>
import math
import functools

import jax
import jax.numpy as jnp
import numpy as np
from jax.experimental import pallas as pl
from jax.experimental.pallas import tpu as pltpu

_CONST = -0.5 * math.log(2.0 * math.pi)


def _round_up(x, m):
    return (x + m - 1) // m * m


def _vmem_capacity_bytes(default=64 << 20):
    """VMEM per TensorCore; 64 MiB (v7x) is the conservative fallback."""
    try:
        cap = getattr(pltpu.get_tpu_info(), "vmem_capacity_bytes", None)
        if cap:
            return int(cap)
    except Exception:
        pass
    return default


def _gm_criterion_kernel(x_ref, tgt_ref, w_ref, b_ref, out_ref, *,
                         d_tgt, n_mix, d_tgt_pad, matmul_dtype):
    """One row-tile of the GM criterion.

    x_ref   : (tile, d_inp)                      f32 (cast to matmul dtype here)
    tgt_ref : (tile, d_tgt)                      f32 raw target
    w_ref   : (d_inp, 3 * n_mix * d_tgt_pad)     matmul dtype, mixture-major
    b_ref   : (1, 3 * n_mix * d_tgt_pad)         f32
    out_ref : (tile, d_tgt)                      f32 negative log-likelihood
    """
    grp = n_mix * d_tgt_pad                       # columns per projection

    # Single fused MXU matmul for mean / log_std / prior (f32 accumulation).
    x = x_ref[...].astype(matmul_dtype)
    y = jnp.dot(x, w_ref[...], preferred_element_type=jnp.float32) + b_ref[...]

    # Broadcast the raw target to the 128-lane target tile in-kernel (the
    # extra lanes feed only padded, discarded output lanes).
    tgt = tgt_ref[...].astype(jnp.float32)
    if d_tgt_pad != d_tgt:
        pad = jnp.zeros((tgt.shape[0], d_tgt_pad - d_tgt), jnp.float32)
        tgt = jnp.concatenate([tgt, pad], axis=-1)

    # Per-mixture slabs are lane-aligned views of y; the mixture LSE below is
    # a per-lane (element-wise) reduction -> no cross-lane XLU work.
    w_slabs, p_slabs = [], []
    for m in range(n_mix):                        # n_mix is small & static
        lo = m * d_tgt_pad
        mean_m = y[:, lo:lo + d_tgt_pad]
        lstd_m = y[:, grp + lo:grp + lo + d_tgt_pad]
        pri_m = y[:, 2 * grp + lo:2 * grp + lo + d_tgt_pad]
        z = (tgt - mean_m) * jnp.exp(-lstd_m)     # exp(-x) instead of divide
        w_slabs.append(pri_m + (_CONST - lstd_m - 0.5 * z * z))
        p_slabs.append(pri_m)

    w_max, p_max = w_slabs[0], p_slabs[0]
    for m in range(1, n_mix):
        w_max = jnp.maximum(w_max, w_slabs[m])
        p_max = jnp.maximum(p_max, p_slabs[m])

    s_w = jnp.exp(w_slabs[0] - w_max)
    s_p = jnp.exp(p_slabs[0] - p_max)
    for m in range(1, n_mix):
        s_w = s_w + jnp.exp(w_slabs[m] - w_max)
        s_p = s_p + jnp.exp(p_slabs[m] - p_max)

    # log_softmax folded into the final LSE:
    #   nll = LSE(prior) - LSE(prior + log_probs)
    nll = (p_max + jnp.log(s_p)) - (w_max + jnp.log(s_w))
    out_ref[...] = nll[:, :d_tgt]


def gm_criterion_pallas(inp, target, params, *, d_tgt, n_mix, tile_n=None,
                        matmul_dtype=jnp.bfloat16):
    """Pallas implementation of GMCriterion.forward (int inp_shape case)."""
    batch_dims = inp.shape[:-1]
    d_inp = inp.shape[-1]
    n_rows = int(np.prod(batch_dims)) if batch_dims else 1

    d_tgt_pad = _round_up(d_tgt, 128)
    grp = n_mix * d_tgt_pad
    w_tot = 3 * grp
    mm_bytes = jnp.dtype(matmul_dtype).itemsize

    # --- Generation-aware VMEM budget (v7x: 64 MiB/TC, v5e/v6e: 128 MiB).
    vmem_cap = _vmem_capacity_bytes()
    budget = int(vmem_cap * 0.45)

    align = 8                                     # f32 sublane tile
    if tile_n is None:
        tile_n = 2048 if vmem_cap >= (96 << 20) else 1024
    max_tile = _round_up(n_rows, align)
    tile = max(align, min(_round_up(tile_n, align), max_tile))
    # >= 2 grid steps when possible: the single "parallel" grid axis is what
    # shards the work across v7x's two TensorCores.
    if max_tile >= 2 * align:
        tile = min(tile, _round_up((n_rows + 1) // 2, align))

    def vmem_est(t):
        return int(
            2 * t * d_inp * 4                     # x blocks (f32, double-buffered)
            + 2 * t * 128 * 4                     # target blocks (lane-padded)
            + 2 * d_inp * w_tot * mm_bytes        # fused weight (budget 2 bufs)
            + 2 * 8 * w_tot * 4                   # fused bias
            + 2 * t * 128 * 4                     # output blocks (lane-padded)
            + t * (w_tot + grp + 2 * 128) * 4)    # y + w slabs + misc temps

    while vmem_est(tile) > budget and tile > align:
        tile = max(align, _round_up(tile // 2, align))

    grid = (pl.cdiv(n_rows, tile),)
    vmem_limit = int(min(max(int(1.25 * vmem_est(tile)), 32 << 20),
                         int(vmem_cap * 0.75)))

    # --- Activations: no wrapper-side pad / repeat / dtype-cast passes.
    x = inp.reshape(n_rows, d_inp)
    tgt = target.reshape(n_rows, d_tgt).astype(jnp.float32)

    # --- Fused weight / bias in mixture-major, lane-padded layout.
    def layout_w(w):                              # (d_inp, d_tgt, n_mix)
        w = jnp.transpose(w.reshape(d_inp, d_tgt, n_mix), (0, 2, 1))
        if d_tgt_pad != d_tgt:
            w = jnp.pad(w, ((0, 0), (0, 0), (0, d_tgt_pad - d_tgt)))
        return w.reshape(d_inp, grp)

    def layout_b(b):                              # (d_tgt, n_mix)
        b = jnp.transpose(b.reshape(d_tgt, n_mix), (1, 0))
        if d_tgt_pad != d_tgt:
            b = jnp.pad(b, ((0, 0), (0, d_tgt_pad - d_tgt)))
        return b.reshape(1, grp)

    w_all = jnp.concatenate([layout_w(params["mean_weight"]),
                             layout_w(params["std_weight"]),
                             layout_w(params["prior_weight"])],
                            axis=-1).astype(matmul_dtype)      # (d_inp, w_tot)
    b_all = jnp.concatenate([layout_b(params["mean_bias"]),
                             layout_b(params["std_bias"]),
                             layout_b(params["prior_bias"])],
                            axis=-1).astype(jnp.float32)        # (1, w_tot)

    kernel = functools.partial(_gm_criterion_kernel, d_tgt=d_tgt, n_mix=n_mix,
                               d_tgt_pad=d_tgt_pad, matmul_dtype=matmul_dtype)

    def build(single_buffer_consts):
        const_kw = ({"pipeline_mode": pl.Buffered(1)}
                    if single_buffer_consts else {})
        return pl.pallas_call(
            kernel,
            out_shape=jax.ShapeDtypeStruct((n_rows, d_tgt), jnp.float32),
            grid_spec=pltpu.PrefetchScalarGridSpec(
                num_scalar_prefetch=0,
                grid=grid,
                in_specs=[
                    pl.BlockSpec((tile, d_inp), lambda n: (n, 0)),    # x rows
                    pl.BlockSpec((tile, d_tgt), lambda n: (n, 0)),    # raw target
                    pl.BlockSpec((d_inp, w_tot), lambda n: (0, 0), **const_kw),
                    pl.BlockSpec((1, w_tot), lambda n: (0, 0), **const_kw),
                ],
                out_specs=pl.BlockSpec((tile, d_tgt), lambda n: (n, 0)),
            ),
            compiler_params=pltpu.CompilerParams(
                dimension_semantics=("parallel",),
                vmem_limit_bytes=vmem_limit),
        )

    try:
        out = jax.block_until_ready(build(True)(x, tgt, w_all, b_all))
    except Exception:   # Buffered(1) unsupported on this jax build -> default bufs
        out = build(False)(x, tgt, w_all, b_all)

    return out.reshape(*batch_dims, d_tgt)


def gm_criterion_ref(inp, target, params, matmul_dtype=None):
    """Pure-JAX reference matching the PyTorch module semantics."""
    def proj(w, b):
        wi, xi = w, inp
        if matmul_dtype is not None:
            wi, xi = w.astype(matmul_dtype), inp.astype(matmul_dtype)
        return jnp.einsum("dim,...d->...im", wi, xi,
                          preferred_element_type=jnp.float32) + b

    mean = proj(params["mean_weight"], params["mean_bias"])
    log_std = proj(params["std_weight"], params["std_bias"])
    prior = proj(params["prior_weight"], params["prior_bias"])
    log_prior = jax.nn.log_softmax(prior, axis=-1)

    tgt_ = target[..., None].astype(jnp.float32)
    log_probs = _CONST - log_std - 0.5 * ((tgt_ - mean) / jnp.exp(log_std)) ** 2
    w = log_prior + log_probs
    w_max = jnp.max(w, axis=-1, keepdims=True)
    log_prob = jnp.log(jnp.sum(jnp.exp(w - w_max), axis=-1)) + w_max[..., 0]
    return -log_prob


def init_params(key, d_inp, d_tgt, n_mix):
    # kaiming_uniform_(a=sqrt(5)) on a (d_inp, d_tgt, n_mix) tensor:
    # fan_in = d_tgt * n_mix, bound = 1 / sqrt(fan_in); biases start at zero.
    bound = 1.0 / math.sqrt(d_tgt * n_mix)
    km, ks, kp = jax.random.split(key, 3)
    shape = (d_inp, d_tgt, n_mix)
    return {
        "mean_weight": jax.random.uniform(km, shape, jnp.float32, -bound, bound),
        "mean_bias": jnp.zeros((d_tgt, n_mix), jnp.float32),
        "std_weight": jax.random.uniform(ks, shape, jnp.float32, -bound, bound),
        "std_bias": jnp.zeros((d_tgt, n_mix), jnp.float32),
        "prior_weight": jax.random.uniform(kp, shape, jnp.float32, -bound, bound),
        "prior_bias": jnp.zeros((d_tgt, n_mix), jnp.float32),
    }


if __name__ == "__main__":
    B, T = 2, 8          # batch, sequence
    d_inp = 32           # input hidden size
    d_tgt = 4            # target feature dim
    n_mix = 8            # mixture components

    key = jax.random.PRNGKey(0)
    k_params, k_inp, k_tgt = jax.random.split(key, 3)

    params = init_params(k_params, d_inp, d_tgt, n_mix)
    inp = jax.random.normal(k_inp, (B, T, d_inp), jnp.float32)
    target = jax.random.normal(k_tgt, (B, T, d_tgt), jnp.float32)

    # f32 matmul path: tight check against the f32 reference.
    nll_f32 = jax.block_until_ready(
        gm_criterion_pallas(inp, target, params, d_tgt=d_tgt, n_mix=n_mix,
                            matmul_dtype=jnp.float32))
    ref_f32 = jax.block_until_ready(gm_criterion_ref(inp, target, params))
    np.testing.assert_allclose(np.asarray(nll_f32), np.asarray(ref_f32),
                               rtol=1e-4, atol=1e-4)

    # bf16 MXU-feeding path (default): compare against a reference whose
    # projections also use bf16 inputs with f32 accumulation.
    nll_bf16 = jax.block_until_ready(
        gm_criterion_pallas(inp, target, params, d_tgt=d_tgt, n_mix=n_mix,
                            matmul_dtype=jnp.bfloat16))
    ref_bf16 = jax.block_until_ready(
        gm_criterion_ref(inp, target, params, matmul_dtype=jnp.bfloat16))
    np.testing.assert_allclose(np.asarray(nll_bf16), np.asarray(ref_bf16),
                               rtol=5e-3, atol=5e-3)

    print("KERNEL_OK")
</pallas_src>

<mosaic_0001>
module attributes {stable_mosaic.version = 11 : i64} {
  func.func @_gm_criterion_kernel(%arg0: i32, %arg1: memref<8x32xf32, #tpu.memory_space<vmem>>, %arg2: memref<8x4xf32, #tpu.memory_space<vmem>>, %arg3: memref<32x3072xf32, #tpu.memory_space<vmem>>, %arg4: memref<1x3072xf32, #tpu.memory_space<vmem>>, %arg5: memref<8x4xf32, #tpu.memory_space<vmem>>) attributes {dimension_semantics = [#tpu.dimension_semantics<parallel>], iteration_bounds = array<i64: 2>, scalar_prefetch = 0 : i64, scratch_operands = 0 : i64, tpu.core_type = #tpu.core_type<tc>, window_params = [{transform_indices = @transform_0, window_bounds = array<i64: 8, 32>}, {transform_indices = @transform_1, window_bounds = array<i64: 8, 4>}, {pipeline_mode = #tpu.pipeline_mode<synchronous>, transform_indices = @transform_2, window_bounds = array<i64: 32, 3072>}, {pipeline_mode = #tpu.pipeline_mode<synchronous>, transform_indices = @transform_3, window_bounds = array<i64: 1, 3072>}, {transform_indices = @transform_4, window_bounds = array<i64: 8, 4>}]} {
    %c0 = arith.constant 0 : index
    %c0_0 = arith.constant 0 : index
    %0 = vector.load %arg1[%c0, %c0_0] : memref<8x32xf32, #tpu.memory_space<vmem>>, vector<8x32xf32>
    %c0_1 = arith.constant 0 : index
    %c0_2 = arith.constant 0 : index
    %1 = vector.load %arg3[%c0_1, %c0_2] : memref<32x3072xf32, #tpu.memory_space<vmem>>, vector<32x3072xf32>
    %cst = arith.constant dense<0.000000e+00> : vector<8x3072xf32>
    %2 = tpu.matmul %0, %1, %cst {dimension_numbers = #tpu.dot_dimension_numbers<[1], [0], [0], [1], [0, 0, 1, 1], [], []>} : vector<8x32xf32>, vector<32x3072xf32>, vector<8x3072xf32> -> vector<8x3072xf32>
    %c0_3 = arith.constant 0 : index
    %c0_4 = arith.constant 0 : index
    %3 = vector.load %arg4[%c0_3, %c0_4] : memref<1x3072xf32, #tpu.memory_space<vmem>>, vector<1x3072xf32>
    %4 = vector.broadcast %3 : vector<1x3072xf32> to vector<8x3072xf32>
    %5 = arith.addf %2, %4 : vector<8x3072xf32>
    %c0_5 = arith.constant 0 : index
    %c0_6 = arith.constant 0 : index
    %6 = vector.load %arg2[%c0_5, %c0_6] : memref<8x4xf32, #tpu.memory_space<vmem>>, vector<8x4xf32>
    %cst_7 = arith.constant 0.000000e+00 : f32
    %7 = vector.broadcast %cst_7 : f32 to vector<8x124xf32>
    %8 = tpu.concatenate %6, %7 in 1 : vector<8x4xf32>, vector<8x124xf32> -> vector<8x128xf32>
    %9 = vector.extract_strided_slice %5 {offsets = [0, 0], sizes = [8, 128], strides = [1, 1]} : vector<8x3072xf32> to vector<8x128xf32>
    %10 = vector.extract_strided_slice %5 {offsets = [0, 1024], sizes = [8, 128], strides = [1, 1]} : vector<8x3072xf32> to vector<8x128xf32>
    %11 = vector.extract_strided_slice %5 {offsets = [0, 2048], sizes = [8, 128], strides = [1, 1]} : vector<8x3072xf32> to vector<8x128xf32>
    %12 = arith.subf %8, %9 : vector<8x128xf32>
    %cst_8 = arith.constant 0.000000e+00 : f32
    %13 = vector.broadcast %cst_8 : f32 to vector<8x128xf32>
    %14 = arith.subf %13, %10 : vector<8x128xf32>
    %15 = math.exp %14 : vector<8x128xf32>
    %16 = arith.mulf %12, %15 : vector<8x128xf32>
    %cst_9 = arith.constant -0.918938517 : f32
    %17 = vector.broadcast %cst_9 : f32 to vector<8x128xf32>
    %18 = arith.subf %17, %10 : vector<8x128xf32>
    %cst_10 = arith.constant 5.000000e-01 : f32
    %19 = vector.broadcast %cst_10 : f32 to vector<8x128xf32>
    %20 = arith.mulf %19, %16 : vector<8x128xf32>
    %21 = arith.mulf %20, %16 : vector<8x128xf32>
    %22 = arith.subf %18, %21 : vector<8x128xf32>
    %23 = arith.addf %11, %22 : vector<8x128xf32>
    %24 = vector.extract_strided_slice %5 {offsets = [0, 128], sizes = [8, 128], strides = [1, 1]} : vector<8x3072xf32> to vector<8x128xf32>
    %25 = vector.extract_strided_slice %5 {offsets = [0, 1152], sizes = [8, 128], strides = [1, 1]} : vector<8x3072xf32> to vector<8x128xf32>
    %26 = vector.extract_strided_slice %5 {offsets = [0, 2176], sizes = [8, 128], strides = [1, 1]} : vector<8x3072xf32> to vector<8x128xf32>
    %27 = arith.subf %8, %24 : vector<8x128xf32>
    %cst_11 = arith.constant 0.000000e+00 : f32
    %28 = vector.broadcast %cst_11 : f32 to vector<8x128xf32>
    %29 = arith.subf %28, %25 : vector<8x128xf32>
    %30 = math.exp %29 : vector<8x128xf32>
    %31 = arith.mulf %27, %30 : vector<8x128xf32>
    %cst_12 = arith.constant -0.918938517 : f32
    %32 = vector.broadcast %cst_12 : f32 to vector<8x128xf32>
    %33 = arith.subf %32, %25 : vector<8x128xf32>
    %cst_13 = arith.constant 5.000000e-01 : f32
    %34 = vector.broadcast %cst_13 : f32 to vector<8x128xf32>
    %35 = arith.mulf %34, %31 : vector<8x128xf32>
    %36 = arith.mulf %35, %31 : vector<8x128xf32>
    %37 = arith.subf %33, %36 : vector<8x128xf32>
    %38 = arith.addf %26, %37 : vector<8x128xf32>
    %39 = vector.extract_strided_slice %5 {offsets = [0, 256], sizes = [8, 128], strides = [1, 1]} : vector<8x3072xf32> to vector<8x128xf32>
    %40 = vector.extract_strided_slice %5 {offsets = [0, 1280], sizes = [8, 128], strides = [1, 1]} : vector<8x3072xf32> to vector<8x128xf32>
    %41 = vector.extract_strided_slice %5 {offsets = [0, 2304], sizes = [8, 128], strides = [1, 1]} : vector<8x3072xf32> to vector<8x128xf32>
    %42 = arith.subf %8, %39 : vector<8x128xf32>
    %cst_14 = arith.constant 0.000000e+00 : f32
    %43 = vector.broadcast %cst_14 : f32 to vector<8x128xf32>
    %44 = arith.subf %43, %40 : vector<8x128xf32>
    %45 = math.exp %44 : vector<8x128xf32>
    %46 = arith.mulf %42, %45 : vector<8x128xf32>
    %cst_15 = arith.constant -0.918938517 : f32
    %47 = vector.broadcast %cst_15 : f32 to vector<8x128xf32>
    %48 = arith.subf %47, %40 : vector<8x128xf32>
    %cst_16 = arith.constant 5.000000e-01 : f32
    %49 = vector.broadcast %cst_16 : f32 to vector<8x128xf32>
    %50 = arith.mulf %49, %46 : vector<8x128xf32>
    %51 = arith.mulf %50, %46 : vector<8x128xf32>
    %52 = arith.subf %48, %51 : vector<8x128xf32>
    %53 = arith.addf %41, %52 : vector<8x128xf32>
    %54 = vector.extract_strided_slice %5 {offsets = [0, 384], sizes = [8, 128], strides = [1, 1]} : vector<8x3072xf32> to vector<8x128xf32>
    %55 = vector.extract_strided_slice %5 {offsets = [0, 1408], sizes = [8, 128], strides = [1, 1]} : vector<8x3072xf32> to vector<8x128xf32>
    %56 = vector.extract_strided_slice %5 {offsets = [0, 2432], sizes = [8, 128], strides = [1, 1]} : vector<8x3072xf32> to vector<8x128xf32>
    %57 = arith.subf %8, %54 : vector<8x128xf32>
    %cst_17 = arith.constant 0.000000e+00 : f32
    %58 = vector.broadcast %cst_17 : f32 to vector<8x128xf32>
    %59 = arith.subf %58, %55 : vector<8x128xf32>
    %60 = math.exp %59 : vector<8x128xf32>
    %61 = arith.mulf %57, %60 : vector<8x128xf32>
    %cst_18 = arith.constant -0.918938517 : f32
    %62 = vector.broadcast %cst_18 : f32 to vector<8x128xf32>
    %63 = arith.subf %62, %55 : vector<8x128xf32>
    %cst_19 = arith.constant 5.000000e-01 : f32
    %64 = vector.broadcast %cst_19 : f32 to vector<8x128xf32>
    %65 = arith.mulf %64, %61 : vector<8x128xf32>
    %66 = arith.mulf %65, %61 : vector<8x128xf32>
    %67 = arith.subf %63, %66 : vector<8x128xf32>
    %68 = arith.addf %56, %67 : vector<8x128xf32>
    %69 = vector.extract_strided_slice %5 {offsets = [0, 512], sizes = [8, 128], strides = [1, 1]} : vector<8x3072xf32> to vector<8x128xf32>
    %70 = vector.extract_strided_slice %5 {offsets = [0, 1536], sizes = [8, 128], strides = [1, 1]} : vector<8x3072xf32> to vector<8x128xf32>
    %71 = vector.extract_strided_slice %5 {offsets = [0, 2560], sizes = [8, 128], strides = [1, 1]} : vector<8x3072xf32> to vector<8x128xf32>
    %72 = arith.subf %8, %69 : vector<8x128xf32>
    %cst_20 = arith.constant 0.000000e+00 : f32
    %73 = vector.broadcast %cst_20 : f32 to vector<8x128xf32>
    %74 = arith.subf %73, %70 : vector<8x128xf32>
    %75 = math.exp %74 : vector<8x128xf32>
    %76 = arith.mulf %72, %75 : vector<8x128xf32>
    %cst_21 = arith.constant -0.918938517 : f32
    %77 = vector.broadcast %cst_21 : f32 to vector<8x128xf32>
    %78 = arith.subf %77, %70 : vector<8x128xf32>
    %cst_22 = arith.constant 5.000000e-01 : f32
    %79 = vector.broadcast %cst_22 : f32 to vector<8x128xf32>
    %80 = arith.mulf %79, %76 : vector<8x128xf32>
    %81 = arith.mulf %80, %76 : vector<8x128xf32>
    %82 = arith.subf %78, %81 : vector<8x128xf32>
    %83 = arith.addf %71, %82 : vector<8x128xf32>
    %84 = vector.extract_strided_slice %5 {offsets = [0, 640], sizes = [8, 128], strides = [1, 1]} : vector<8x3072xf32> to vector<8x128xf32>
    %85 = vector.extract_strided_slice %5 {offsets = [0, 1664], sizes = [8, 128], strides = [1, 1]} : vector<8x3072xf32> to vector<8x128xf32>
    %86 = vector.extract_strided_slice %5 {offsets = [0, 2688], sizes = [8, 128], strides = [1, 1]} : vector<8x3072xf32> to vector<8x128xf32>
    %87 = arith.subf %8, %84 : vector<8x128xf32>
    %cst_23 = arith.constant 0.000000e+00 : f32
    %88 = vector.broadcast %cst_23 : f32 to vector<8x128xf32>
    %89 = arith.subf %88, %85 : vector<8x128xf32>
    %90 = math.exp %89 : vector<8x128xf32>
    %91 = arith.mulf %87, %90 : vector<8x128xf32>
    %cst_24 = arith.constant -0.918938517 : f32
    %92 = vector.broadcast %cst_24 : f32 to vector<8x128xf32>
    %93 = arith.subf %92, %85 : vector<8x128xf32>
    %cst_25 = arith.constant 5.000000e-01 : f32
    %94 = vector.broadcast %cst_25 : f32 to vector<8x128xf32>
    %95 = arith.mulf %94, %91 : vector<8x128xf32>
    %96 = arith.mulf %95, %91 : vector<8x128xf32>
    %97 = arith.subf %93, %96 : vector<8x128xf32>
    %98 = arith.addf %86, %97 : vector<8x128xf32>
    %99 = vector.extract_strided_slice %5 {offsets = [0, 768], sizes = [8, 128], strides = [1, 1]} : vector<8x3072xf32> to vector<8x128xf32>
    %100 = vector.extract_strided_slice %5 {offsets = [0, 1792], sizes = [8, 128], strides = [1, 1]} : vector<8x3072xf32> to vector<8x128xf32>
    %101 = vector.extract_strided_slice %5 {offsets = [0, 2816], sizes = [8, 128], strides = [1, 1]} : vector<8x3072xf32> to vector<8x128xf32>
    %102 = arith.subf %8, %99 : vector<8x128xf32>
    %cst_26 = arith.constant 0.000000e+00 : f32
    %103 = vector.broadcast %cst_26 : f32 to vector<8x128xf32>
    %104 = arith.subf %103, %100 : vector<8x128xf32>
    %105 = math.exp %104 : vector<8x128xf32>
    %106 = arith.mulf %102, %105 : vector<8x128xf32>
    %cst_27 = arith.constant -0.918938517 : f32
    %107 = vector.broadcast %cst_27 : f32 to vector<8x128xf32>
    %108 = arith.subf %107, %100 : vector<8x128xf32>
    %cst_28 = arith.constant 5.000000e-01 : f32
    %109 = vector.broadcast %cst_28 : f32 to vector<8x128xf32>
    %110 = arith.mulf %109, %106 : vector<8x128xf32>
    %111 = arith.mulf %110, %106 : vector<8x128xf32>
    %112 = arith.subf %108, %111 : vector<8x128xf32>
    %113 = arith.addf %101, %112 : vector<8x128xf32>
    %114 = vector.extract_strided_slice %5 {offsets = [0, 896], sizes = [8, 128], strides = [1, 1]} : vector<8x3072xf32> to vector<8x128xf32>
    %115 = vector.extract_strided_slice %5 {offsets = [0, 1920], sizes = [8, 128], strides = [1, 1]} : vector<8x3072xf32> to vector<8x128xf32>
    %116 = vector.extract_strided_slice %5 {offsets = [0, 2944], sizes = [8, 128], strides = [1, 1]} : vector<8x3072xf32> to vector<8x128xf32>
    %117 = arith.subf %8, %114 : vector<8x128xf32>
    %cst_29 = arith.constant 0.000000e+00 : f32
    %118 = vector.broadcast %cst_29 : f32 to vector<8x128xf32>
    %119 = arith.subf %118, %115 : vector<8x128xf32>
    %120 = math.exp %119 : vector<8x128xf32>
    %121 = arith.mulf %117, %120 : vector<8x128xf32>
    %cst_30 = arith.constant -0.918938517 : f32
    %122 = vector.broadcast %cst_30 : f32 to vector<8x128xf32>
    %123 = arith.subf %122, %115 : vector<8x128xf32>
    %cst_31 = arith.constant 5.000000e-01 : f32
    %124 = vector.broadcast %cst_31 : f32 to vector<8x128xf32>
    %125 = arith.mulf %124, %121 : vector<8x128xf32>
    %126 = arith.mulf %125, %121 : vector<8x128xf32>
    %127 = arith.subf %123, %126 : vector<8x128xf32>
    %128 = arith.addf %116, %127 : vector<8x128xf32>
    %129 = arith.maximumf %23, %38 : vector<8x128xf32>
    %130 = arith.maximumf %11, %26 : vector<8x128xf32>
    %131 = arith.maximumf %129, %53 : vector<8x128xf32>
    %132 = arith.maximumf %130, %41 : vector<8x128xf32>
    %133 = arith.maximumf %131, %68 : vector<8x128xf32>
    %134 = arith.maximumf %132, %56 : vector<8x128xf32>
    %135 = arith.maximumf %133, %83 : vector<8x128xf32>
    %136 = arith.maximumf %134, %71 : vector<8x128xf32>
    %137 = arith.maximumf %135, %98 : vector<8x128xf32>
    %138 = arith.maximumf %136, %86 : vector<8x128xf32>
    %139 = arith.maximumf %137, %113 : vector<8x128xf32>
    %140 = arith.maximumf %138, %101 : vector<8x128xf32>
    %141 = arith.maximumf %139, %128 : vector<8x128xf32>
    %142 = arith.maximumf %140, %116 : vector<8x128xf32>
    %143 = arith.subf %23, %141 : vector<8x128xf32>
    %144 = math.exp %143 : vector<8x128xf32>
    %145 = arith.subf %11, %142 : vector<8x128xf32>
    %146 = math.exp %145 : vector<8x128xf32>
    %147 = arith.subf %38, %141 : vector<8x128xf32>
    %148 = math.exp %147 : vector<8x128xf32>
    %149 = arith.addf %144, %148 : vector<8x128xf32>
    %150 = arith.subf %26, %142 : vector<8x128xf32>
    %151 = math.exp %150 : vector<8x128xf32>
    %152 = arith.addf %146, %151 : vector<8x128xf32>
    %153 = arith.subf %53, %141 : vector<8x128xf32>
    %154 = math.exp %153 : vector<8x128xf32>
    %155 = arith.addf %149, %154 : vector<8x128xf32>
    %156 = arith.subf %41, %142 : vector<8x128xf32>
    %157 = math.exp %156 : vector<8x128xf32>
    %158 = arith.addf %152, %157 : vector<8x128xf32>
    %159 = arith.subf %68, %141 : vector<8x128xf32>
    %160 = math.exp %159 : vector<8x128xf32>
    %161 = arith.addf %155, %160 : vector<8x128xf32>
    %162 = arith.subf %56, %142 : vector<8x128xf32>
    %163 = math.exp %162 : vector<8x128xf32>
    %164 = arith.addf %158, %163 : vector<8x128xf32>
    %165 = arith.subf %83, %141 : vector<8x128xf32>
    %166 = math.exp %165 : vector<8x128xf32>
    %167 = arith.addf %161, %166 : vector<8x128xf32>
    %168 = arith.subf %71, %142 : vector<8x128xf32>
    %169 = math.exp %168 : vector<8x128xf32>
    %170 = arith.addf %164, %169 : vector<8x128xf32>
    %171 = arith.subf %98, %141 : vector<8x128xf32>
    %172 = math.exp %171 : vector<8x128xf32>
    %173 = arith.addf %167, %172 : vector<8x128xf32>
    %174 = arith.subf %86, %142 : vector<8x128xf32>
    %175 = math.exp %174 : vector<8x128xf32>
    %176 = arith.addf %170, %175 : vector<8x128xf32>
    %177 = arith.subf %113, %141 : vector<8x128xf32>
    %178 = math.exp %177 : vector<8x128xf32>
    %179 = arith.addf %173, %178 : vector<8x128xf32>
    %180 = arith.subf %101, %142 : vector<8x128xf32>
    %181 = math.exp %180 : vector<8x128xf32>
    %182 = arith.addf %176, %181 : vector<8x128xf32>
    %183 = arith.subf %128, %141 : vector<8x128xf32>
    %184 = math.exp %183 : vector<8x128xf32>
    %185 = arith.addf %179, %184 : vector<8x128xf32>
    %186 = arith.subf %116, %142 : vector<8x128xf32>
    %187 = math.exp %186 : vector<8x128xf32>
    %188 = arith.addf %182, %187 : vector<8x128xf32>
    %189 = math.log %188 : vector<8x128xf32>
    %190 = arith.addf %142, %189 : vector<8x128xf32>
    %191 = math.log %185 : vector<8x128xf32>
    %192 = arith.addf %141, %191 : vector<8x128xf32>
    %193 = arith.subf %190, %192 : vector<8x128xf32>
    %194 = vector.extract_strided_slice %193 {offsets = [0, 0], sizes = [8, 4], strides = [1, 1]} : vector<8x128xf32> to vector<8x4xf32>
    %c0_32 = arith.constant 0 : index
    %c0_33 = arith.constant 0 : index
    %195 = vector.load %arg5[%c0_32, %c0_33] : memref<8x4xf32, #tpu.memory_space<vmem>>, vector<8x4xf32>
    tpu.vector_store %arg5[%c0_32, %c0_33], %194 {strides = array<i32>} : memref<8x4xf32, #tpu.memory_space<vmem>>, vector<8x4xf32>,
    return
  }
  func.func @transform_0(%arg0: i32) -> (i32, i32) {
    %c0_i32 = arith.constant 0 : i32
    %c0_i32_0 = arith.constant 0 : i32
    return %arg0, %c0_i32 : i32, i32
  }
  func.func @transform_1(%arg0: i32) -> (i32, i32) {
    %c0_i32 = arith.constant 0 : i32
    %c0_i32_0 = arith.constant 0 : i32
    return %arg0, %c0_i32 : i32, i32
  }
  func.func @transform_2(%arg0: i32) -> (i32, i32) {
    %c0_i32 = arith.constant 0 : i32
    %c0_i32_0 = arith.constant 0 : i32
    %c0_i32_1 = arith.constant 0 : i32
    return %c0_i32, %c0_i32_0 : i32, i32
  }
  func.func @transform_3(%arg0: i32) -> (i32, i32) {
    %c0_i32 = arith.constant 0 : i32
    %c0_i32_0 = arith.constant 0 : i32
    %c0_i32_1 = arith.constant 0 : i32
    return %c0_i32, %c0_i32_0 : i32, i32
  }
  func.func @transform_4(%arg0: i32) -> (i32, i32) {
    %c0_i32 = arith.constant 0 : i32
    %c0_i32_0 = arith.constant 0 : i32
    return %arg0, %c0_i32 : i32, i32
  }
}

module attributes {stable_mosaic.version = 11 : i64} {
  func.func @_gm_criterion_kernel(%arg0: i32, %arg1: memref<8x32xf32, #tpu.memory_space<vmem>>, %arg2: memref<8x4xf32, #tpu.memory_space<vmem>>, %arg3: memref<32x3072xf32, #tpu.memory_space<vmem>>, %arg4: memref<1x3072xf32, #tpu.memory_space<vmem>>, %arg5: memref<8x4xf32, #tpu.memory_space<vmem>>) attributes {dimension_semantics = [#tpu.dimension_semantics<parallel>], iteration_bounds = array<i64: 2>, scalar_prefetch = 0 : i64, scratch_operands = 0 : i64, tpu.core_type = #tpu.core_type<tc>, window_params = [{transform_indices = @transform_0, window_bounds = array<i64: 8, 32>}, {transform_indices = @transform_1, window_bounds = array<i64: 8, 4>}, {pipeline_mode = #tpu.pipeline_mode<synchronous>, transform_indices = @transform_2, window_bounds = array<i64: 32, 3072>}, {pipeline_mode = #tpu.pipeline_mode<synchronous>, transform_indices = @transform_3, window_bounds = array<i64: 1, 3072>}, {transform_indices = @transform_4, window_bounds = array<i64: 8, 4>}]} {
    %c0 = arith.constant 0 : index
    %c0_0 = arith.constant 0 : index
    %0 = vector.load %arg1[%c0, %c0_0] : memref<8x32xf32, #tpu.memory_space<vmem>>, vector<8x32xf32>
    %c0_1 = arith.constant 0 : index
    %c0_2 = arith.constant 0 : index
    %1 = vector.load %arg3[%c0_1, %c0_2] : memref<32x3072xf32, #tpu.memory_space<vmem>>, vector<32x3072xf32>
    %cst = arith.constant dense<0.000000e+00> : vector<8x3072xf32>
    %2 = tpu.matmul %0, %1, %cst {dimension_numbers = #tpu.dot_dimension_numbers<[1], [0], [0], [1], [0, 0, 1, 1], [], []>} : vector<8x32xf32>, vector<32x3072xf32>, vector<8x3072xf32> -> vector<8x3072xf32>
    %c0_3 = arith.constant 0 : index
    %c0_4 = arith.constant 0 : index
    %3 = vector.load %arg4[%c0_3, %c0_4] : memref<1x3072xf32, #tpu.memory_space<vmem>>, vector<1x3072xf32>
    %4 = vector.broadcast %3 : vector<1x3072xf32> to vector<8x3072xf32>
    %5 = arith.addf %2, %4 : vector<8x3072xf32>
    %c0_5 = arith.constant 0 : index
    %c0_6 = arith.constant 0 : index
    %6 = vector.load %arg2[%c0_5, %c0_6] : memref<8x4xf32, #tpu.memory_space<vmem>>, vector<8x4xf32>
    %cst_7 = arith.constant 0.000000e+00 : f32
    %7 = vector.broadcast %cst_7 : f32 to vector<8x124xf32>
    %8 = tpu.concatenate %6, %7 in 1 : vector<8x4xf32>, vector<8x124xf32> -> vector<8x128xf32>
    %9 = vector.extract_strided_slice %5 {offsets = [0, 0], sizes = [8, 128], strides = [1, 1]} : vector<8x3072xf32> to vector<8x128xf32>
    %10 = vector.extract_strided_slice %5 {offsets = [0, 1024], sizes = [8, 128], strides = [1, 1]} : vector<8x3072xf32> to vector<8x128xf32>
    %11 = vector.extract_strided_slice %5 {offsets = [0, 2048], sizes = [8, 128], strides = [1, 1]} : vector<8x3072xf32> to vector<8x128xf32>
    %12 = arith.subf %8, %9 : vector<8x128xf32>
    %cst_8 = arith.constant 0.000000e+00 : f32
    %13 = vector.broadcast %cst_8 : f32 to vector<8x128xf32>
    %14 = arith.subf %13, %10 : vector<8x128xf32>
    %15 = math.exp %14 : vector<8x128xf32>
    %16 = arith.mulf %12, %15 : vector<8x128xf32>
    %cst_9 = arith.constant -0.918938517 : f32
    %17 = vector.broadcast %cst_9 : f32 to vector<8x128xf32>
    %18 = arith.subf %17, %10 : vector<8x128xf32>
    %cst_10 = arith.constant 5.000000e-01 : f32
    %19 = vector.broadcast %cst_10 : f32 to vector<8x128xf32>
    %20 = arith.mulf %19, %16 : vector<8x128xf32>
    %21 = arith.mulf %20, %16 : vector<8x128xf32>
    %22 = arith.subf %18, %21 : vector<8x128xf32>
    %23 = arith.addf %11, %22 : vector<8x128xf32>
    %24 = vector.extract_strided_slice %5 {offsets = [0, 128], sizes = [8, 128], strides = [1, 1]} : vector<8x3072xf32> to vector<8x128xf32>
    %25 = vector.extract_strided_slice %5 {offsets = [0, 1152], sizes = [8, 128], strides = [1, 1]} : vector<8x3072xf32> to vector<8x128xf32>
    %26 = vector.extract_strided_slice %5 {offsets = [0, 2176], sizes = [8, 128], strides = [1, 1]} : vector<8x3072xf32> to vector<8x128xf32>
    %27 = arith.subf %8, %24 : vector<8x128xf32>
    %cst_11 = arith.constant 0.000000e+00 : f32
    %28 = vector.broadcast %cst_11 : f32 to vector<8x128xf32>
    %29 = arith.subf %28, %25 : vector<8x128xf32>
    %30 = math.exp %29 : vector<8x128xf32>
    %31 = arith.mulf %27, %30 : vector<8x128xf32>
    %cst_12 = arith.constant -0.918938517 : f32
    %32 = vector.broadcast %cst_12 : f32 to vector<8x128xf32>
    %33 = arith.subf %32, %25 : vector<8x128xf32>
    %cst_13 = arith.constant 5.000000e-01 : f32
    %34 = vector.broadcast %cst_13 : f32 to vector<8x128xf32>
    %35 = arith.mulf %34, %31 : vector<8x128xf32>
    %36 = arith.mulf %35, %31 : vector<8x128xf32>
    %37 = arith.subf %33, %36 : vector<8x128xf32>
    %38 = arith.addf %26, %37 : vector<8x128xf32>
    %39 = vector.extract_strided_slice %5 {offsets = [0, 256], sizes = [8, 128], strides = [1, 1]} : vector<8x3072xf32> to vector<8x128xf32>
    %40 = vector.extract_strided_slice %5 {offsets = [0, 1280], sizes = [8, 128], strides = [1, 1]} : vector<8x3072xf32> to vector<8x128xf32>
    %41 = vector.extract_strided_slice %5 {offsets = [0, 2304], sizes = [8, 128], strides = [1, 1]} : vector<8x3072xf32> to vector<8x128xf32>
    %42 = arith.subf %8, %39 : vector<8x128xf32>
    %cst_14 = arith.constant 0.000000e+00 : f32
    %43 = vector.broadcast %cst_14 : f32 to vector<8x128xf32>
    %44 = arith.subf %43, %40 : vector<8x128xf32>
    %45 = math.exp %44 : vector<8x128xf32>
    %46 = arith.mulf %42, %45 : vector<8x128xf32>
    %cst_15 = arith.constant -0.918938517 : f32
    %47 = vector.broadcast %cst_15 : f32 to vector<8x128xf32>
    %48 = arith.subf %47, %40 : vector<8x128xf32>
    %cst_16 = arith.constant 5.000000e-01 : f32
    %49 = vector.broadcast %cst_16 : f32 to vector<8x128xf32>
    %50 = arith.mulf %49, %46 : vector<8x128xf32>
    %51 = arith.mulf %50, %46 : vector<8x128xf32>
    %52 = arith.subf %48, %51 : vector<8x128xf32>
    %53 = arith.addf %41, %52 : vector<8x128xf32>
    %54 = vector.extract_strided_slice %5 {offsets = [0, 384], sizes = [8, 128], strides = [1, 1]} : vector<8x3072xf32> to vector<8x128xf32>
    %55 = vector.extract_strided_slice %5 {offsets = [0, 1408], sizes = [8, 128], strides = [1, 1]} : vector<8x3072xf32> to vector<8x128xf32>
    %56 = vector.extract_strided_slice %5 {offsets = [0, 2432], sizes = [8, 128], strides = [1, 1]} : vector<8x3072xf32> to vector<8x128xf32>
    %57 = arith.subf %8, %54 : vector<8x128xf32>
    %cst_17 = arith.constant 0.000000e+00 : f32
    %58 = vector.broadcast %cst_17 : f32 to vector<8x128xf32>
    %59 = arith.subf %58, %55 : vector<8x128xf32>
    %60 = math.exp %59 : vector<8x128xf32>
    %61 = arith.mulf %57, %60 : vector<8x128xf32>
    %cst_18 = arith.constant -0.918938517 : f32
    %62 = vector.broadcast %cst_18 : f32 to vector<8x128xf32>
    %63 = arith.subf %62, %55 : vector<8x128xf32>
    %cst_19 = arith.constant 5.000000e-01 : f32
    %64 = vector.broadcast %cst_19 : f32 to vector<8x128xf32>
    %65 = arith.mulf %64, %61 : vector<8x128xf32>
    %66 = arith.mulf %65, %61 : vector<8x128xf32>
    %67 = arith.subf %63, %66 : vector<8x128xf32>
    %68 = arith.addf %56, %67 : vector<8x128xf32>
    %69 = vector.extract_strided_slice %5 {offsets = [0, 512], sizes = [8, 128], strides = [1, 1]} : vector<8x3072xf32> to vector<8x128xf32>
    %70 = vector.extract_strided_slice %5 {offsets = [0, 1536], sizes = [8, 128], strides = [1, 1]} : vector<8x3072xf32> to vector<8x128xf32>
    %71 = vector.extract_strided_slice %5 {offsets = [0, 2560], sizes = [8, 128], strides = [1, 1]} : vector<8x3072xf32> to vector<8x128xf32>
    %72 = arith.subf %8, %69 : vector<8x128xf32>
    %cst_20 = arith.constant 0.000000e+00 : f32
    %73 = vector.broadcast %cst_20 : f32 to vector<8x128xf32>
    %74 = arith.subf %73, %70 : vector<8x128xf32>
    %75 = math.exp %74 : vector<8x128xf32>
    %76 = arith.mulf %72, %75 : vector<8x128xf32>
    %cst_21 = arith.constant -0.918938517 : f32
    %77 = vector.broadcast %cst_21 : f32 to vector<8x128xf32>
    %78 = arith.subf %77, %70 : vector<8x128xf32>
    %cst_22 = arith.constant 5.000000e-01 : f32
    %79 = vector.broadcast %cst_22 : f32 to vector<8x128xf32>
    %80 = arith.mulf %79, %76 : vector<8x128xf32>
    %81 = arith.mulf %80, %76 : vector<8x128xf32>
    %82 = arith.subf %78, %81 : vector<8x128xf32>
    %83 = arith.addf %71, %82 : vector<8x128xf32>
    %84 = vector.extract_strided_slice %5 {offsets = [0, 640], sizes = [8, 128], strides = [1, 1]} : vector<8x3072xf32> to vector<8x128xf32>
    %85 = vector.extract_strided_slice %5 {offsets = [0, 1664], sizes = [8, 128], strides = [1, 1]} : vector<8x3072xf32> to vector<8x128xf32>
    %86 = vector.extract_strided_slice %5 {offsets = [0, 2688], sizes = [8, 128], strides = [1, 1]} : vector<8x3072xf32> to vector<8x128xf32>
    %87 = arith.subf %8, %84 : vector<8x128xf32>
    %cst_23 = arith.constant 0.000000e+00 : f32
    %88 = vector.broadcast %cst_23 : f32 to vector<8x128xf32>
    %89 = arith.subf %88, %85 : vector<8x128xf32>
    %90 = math.exp %89 : vector<8x128xf32>
    %91 = arith.mulf %87, %90 : vector<8x128xf32>
    %cst_24 = arith.constant -0.918938517 : f32
    %92 = vector.broadcast %cst_24 : f32 to vector<8x128xf32>
    %93 = arith.subf %92, %85 : vector<8x128xf32>
    %cst_25 = arith.constant 5.000000e-01 : f32
    %94 = vector.broadcast %cst_25 : f32 to vector<8x128xf32>
    %95 = arith.mulf %94, %91 : vector<8x128xf32>
    %96 = arith.mulf %95, %91 : vector<8x128xf32>
    %97 = arith.subf %93, %96 : vector<8x128xf32>
    %98 = arith.addf %86, %97 : vector<8x128xf32>
    %99 = vector.extract_strided_slice %5 {offsets = [0, 768], sizes = [8, 128], strides = [1, 1]} : vector<8x3072xf32> to vector<8x128xf32>
    %100 = vector.extract_strided_slice %5 {offsets = [0, 1792], sizes = [8, 128], strides = [1, 1]} : vector<8x3072xf32> to vector<8x128xf32>
    %101 = vector.extract_strided_slice %5 {offsets = [0, 2816], sizes = [8, 128], strides = [1, 1]} : vector<8x3072xf32> to vector<8x128xf32>
    %102 = arith.subf %8, %99 : vector<8x128xf32>
    %cst_26 = arith.constant 0.000000e+00 : f32
    %103 = vector.broadcast %cst_26 : f32 to vector<8x128xf32>
    %104 = arith.subf %103, %100 : vector<8x128xf32>
    %105 = math.exp %104 : vector<8x128xf32>
    %106 = arith.mulf %102, %105 : vector<8x128xf32>
    %cst_27 = arith.constant -0.918938517 : f32
    %107 = vector.broadcast %cst_27 : f32 to vector<8x128xf32>
    %108 = arith.subf %107, %100 : vector<8x128xf32>
    %cst_28 = arith.constant 5.000000e-01 : f32
    %109 = vector.broadcast %cst_28 : f32 to vector<8x128xf32>
    %110 = arith.mulf %109, %106 : vector<8x128xf32>
    %111 = arith.mulf %110, %106 : vector<8x128xf32>
    %112 = arith.subf %108, %111 : vector<8x128xf32>
    %113 = arith.addf %101, %112 : vector<8x128xf32>
    %114 = vector.extract_strided_slice %5 {offsets = [0, 896], sizes = [8, 128], strides = [1, 1]} : vector<8x3072xf32> to vector<8x128xf32>
    %115 = vector.extract_strided_slice %5 {offsets = [0, 1920], sizes = [8, 128], strides = [1, 1]} : vector<8x3072xf32> to vector<8x128xf32>
    %116 = vector.extract_strided_slice %5 {offsets = [0, 2944], sizes = [8, 128], strides = [1, 1]} : vector<8x3072xf32> to vector<8x128xf32>
    %117 = arith.subf %8, %114 : vector<8x128xf32>
    %cst_29 = arith.constant 0.000000e+00 : f32
    %118 = vector.broadcast %cst_29 : f32 to vector<8x128xf32>
    %119 = arith.subf %118, %115 : vector<8x128xf32>
    %120 = math.exp %119 : vector<8x128xf32>
    %121 = arith.mulf %117, %120 : vector<8x128xf32>
    %cst_30 = arith.constant -0.918938517 : f32
    %122 = vector.broadcast %cst_30 : f32 to vector<8x128xf32>
    %123 = arith.subf %122, %115 : vector<8x128xf32>
    %cst_31 = arith.constant 5.000000e-01 : f32
    %124 = vector.broadcast %cst_31 : f32 to vector<8x128xf32>
    %125 = arith.mulf %124, %121 : vector<8x128xf32>
    %126 = arith.mulf %125, %121 : vector<8x128xf32>
    %127 = arith.subf %123, %126 : vector<8x128xf32>
    %128 = arith.addf %116, %127 : vector<8x128xf32>
    %129 = arith.maximumf %23, %38 : vector<8x128xf32>
    %130 = arith.maximumf %11, %26 : vector<8x128xf32>
    %131 = arith.maximumf %129, %53 : vector<8x128xf32>
    %132 = arith.maximumf %130, %41 : vector<8x128xf32>
    %133 = arith.maximumf %131, %68 : vector<8x128xf32>
    %134 = arith.maximumf %132, %56 : vector<8x128xf32>
    %135 = arith.maximumf %133, %83 : vector<8x128xf32>
    %136 = arith.maximumf %134, %71 : vector<8x128xf32>
    %137 = arith.maximumf %135, %98 : vector<8x128xf32>
    %138 = arith.maximumf %136, %86 : vector<8x128xf32>
    %139 = arith.maximumf %137, %113 : vector<8x128xf32>
    %140 = arith.maximumf %138, %101 : vector<8x128xf32>
    %141 = arith.maximumf %139, %128 : vector<8x128xf32>
    %142 = arith.maximumf %140, %116 : vector<8x128xf32>
    %143 = arith.subf %23, %141 : vector<8x128xf32>
    %144 = math.exp %143 : vector<8x128xf32>
    %145 = arith.subf %11, %142 : vector<8x128xf32>
    %146 = math.exp %145 : vector<8x128xf32>
    %147 = arith.subf %38, %141 : vector<8x128xf32>
    %148 = math.exp %147 : vector<8x128xf32>
    %149 = arith.addf %144, %148 : vector<8x128xf32>
    %150 = arith.subf %26, %142 : vector<8x128xf32>
    %151 = math.exp %150 : vector<8x128xf32>
    %152 = arith.addf %146, %151 : vector<8x128xf32>
    %153 = arith.subf %53, %141 : vector<8x128xf32>
    %154 = math.exp %153 : vector<8x128xf32>
    %155 = arith.addf %149, %154 : vector<8x128xf32>
    %156 = arith.subf %41, %142 : vector<8x128xf32>
    %157 = math.exp %156 : vector<8x128xf32>
    %158 = arith.addf %152, %157 : vector<8x128xf32>
    %159 = arith.subf %68, %141 : vector<8x128xf32>
    %160 = math.exp %159 : vector<8x128xf32>
    %161 = arith.addf %155, %160 : vector<8x128xf32>
    %162 = arith.subf %56, %142 : vector<8x128xf32>
    %163 = math.exp %162 : vector<8x128xf32>
    %164 = arith.addf %158, %163 : vector<8x128xf32>
    %165 = arith.subf %83, %141 : vector<8x128xf32>
    %166 = math.exp %165 : vector<8x128xf32>
    %167 = arith.addf %161, %166 : vector<8x128xf32>
    %168 = arith.subf %71, %142 : vector<8x128xf32>
    %169 = math.exp %168 : vector<8x128xf32>
    %170 = arith.addf %164, %169 : vector<8x128xf32>
    %171 = arith.subf %98, %141 : vector<8x128xf32>
    %172 = math.exp %171 : vector<8x128xf32>
    %173 = arith.addf %167, %172 : vector<8x128xf32>
    %174 = arith.subf %86, %142 : vector<8x128xf32>
    %175 = math.exp %174 : vector<8x128xf32>
    %176 = arith.addf %170, %175 : vector<8x128xf32>
    %177 = arith.subf %113, %141 : vector<8x128xf32>
    %178 = math.exp %177 : vector<8x128xf32>
    %179 = arith.addf %173, %178 : vector<8x128xf32>
    %180 = arith.subf %101, %142 : vector<8x128xf32>
    %181 = math.exp %180 : vector<8x128xf32>
    %182 = arith.addf %176, %181 : vector<8x128xf32>
    %183 = arith.subf %128, %141 : vector<8x128xf32>
    %184 = math.exp %183 : vector<8x128xf32>
    %185 = arith.addf %179, %184 : vector<8x128xf32>
    %186 = arith.subf %116, %142 : vector<8x128xf32>
    %187 = math.exp %186 : vector<8x128xf32>
    %188 = arith.addf %182, %187 : vector<8x128xf32>
    %189 = math.log %188 : vector<8x128xf32>
    %190 = arith.addf %142, %189 : vector<8x128xf32>
    %191 = math.log %185 : vector<8x128xf32>
    %192 = arith.addf %141, %191 : vector<8x128xf32>
    %193 = arith.subf %190, %192 : vector<8x128xf32>
    %194 = vector.extract_strided_slice %193 {offsets = [0, 0], sizes = [8, 4], strides = [1, 1]} : vector<8x128xf32> to vector<8x4xf32>
    %c0_32 = arith.constant 0 : index
    %c0_33 = arith.constant 0 : index
    %195 = vector.load %arg5[%c0_32, %c0_33] : memref<8x4xf32, #tpu.memory_space<vmem>>, vector<8x4xf32>
    tpu.vector_store %arg5[%c0_32, %c0_33], %194 {strides = array<i32>} : memref<8x4xf32, #tpu.memory_space<vmem>>, vector<8x4xf32>,
    return
  }
  func.func @transform_0(%arg0: i32) -> (i32, i32) {
    %c0_i32 = arith.constant 0 : i32
    %c0_i32_0 = arith.constant 0 : i32
    return %arg0, %c0_i32 : i32, i32
  }
  func.func @transform_1(%arg0: i32) -> (i32, i32) {
    %c0_i32 = arith.constant 0 : i32
    %c0_i32_0 = arith.constant 0 : i32
    return %arg0, %c0_i32 : i32, i32
  }
  func.func @transform_2(%arg0: i32) -> (i32, i32) {
    %c0_i32 = arith.constant 0 : i32
    %c0_i32_0 = arith.constant 0 : i32
    %c0_i32_1 = arith.constant 0 : i32
    return %c0_i32, %c0_i32_0 : i32, i32
  }
  func.func @transform_3(%arg0: i32) -> (i32, i32) {
    %c0_i32 = arith.constant 0 : i32
    %c0_i32_0 = arith.constant 0 : i32
    %c0_i32_1 = arith.constant 0 : i32
    return %c0_i32, %c0_i32_0 : i32, i32
  }
  func.func @transform_4(%arg0: i32) -> (i32, i32) {
    %c0_i32 = arith.constant 0 : i32
    %c0_i32_0 = arith.constant 0 : i32
    return %arg0, %c0_i32 : i32, i32
  }
}

</mosaic_0001>

<bundles_post_ra>
// kernel: tpu_custom_call.1
= control target key start
LH: loop header
LB: loop body
LE: loop exit
PB: predicated region body
PF: predicated region fallthrough
CT: control target
= control target key end

     0   :  { %9 = vsyncpa [#allocation3], 0  ;;  %s2353_s0 = inlined_call_operand.hbm [shape: f32[16,32], index: 0, kind: input, shape index: {}]   ;;  %s2354_s1 = inlined_call_operand.vmem [shape: f32[16,4], index: 1, kind: input, shape index: {}]   ;;  %s2355_s2 = inlined_call_operand.hbm [shape: f32[32,3072], index: 2, kind: input, shape index: {}]   ;;  %s2356_s3 = inlined_call_operand.vmem [shape: f32[1,3072], index: 3, kind: input, shape index: {}]   ;;  %s2357_s4 = inlined_call_operand.vmem [shape: f32[16,4], index: 4, kind: output, shape index: {}]  }
   0x1   :  { %11 = vsyncpa [#allocation3 + $0x1], 0 }
   0x2   :  { %12 = vsyncpa [#allocation5], 0  ;;  %s1932_s15 = smov 0   ;;  %s1934_s16 = smov 0  }
   0x3   :  { %s1936_s17 = smov 0   ;;  %s1938_s18 = smov 0  }
   0x4 LB: > { %s1951_s19 = sadd.s32 4294967295, %s1900_s18   ;;  %p38_p0 = scmp.ne.s32.totalorder %s1892_s16, %s1888_s15  ;;  %s1900_s18 = sphi %s1938_s18, %s2372_s18   ;;  %s1896_s17 = sphi %s1936_s17, %s2371_s17   ;;  %s1892_s16 = sphi %s1934_s16, %s2370_s16   ;;  %s1888_s15 = sphi %s1932_s15, %s2369_s15  }
   0x5   : > { %p2358_p1 = scmp.eq.s32.totalorder %s1951_s19, 0  ;;  %p1579_p2 = scmp.ge.s32.totalorder %s1900_s18, 1 }
   0x6   : > { %p143_p3 = scmp.lt.s32.totalorder %s1900_s18, 3  ;;  %s1902_s22 = smov [#allocation4]  }
   0x7   : > { %p1959_p4 = por %p2358_p1, %p38_p0  ;;  %s155_s23 = sshll.u32 %s1902_s22, 4  ;;  %s156_s23 = int_to_ptr.vmem [resolvable:$true] %s155_s23 }
   0x8   : > { %p1963_p5 = pnand %p1579_p2, %p143_p3  ;;  %s1976_s25 = sadd.s32 1, %s1900_s18  }
   0x9   : > { %s2361_s20 = scalar_select %p1959_p4, 1, 0 }
   0xa   : > { %s2362_s21 = scalar_select %p1963_p5, 1, 0 }
   0xb   : > { %p1705_p6 = pneg %p1963_p5  ;;  %s25_s26 = sadd.s32 1, %s1896_s17 }
   0xc   : > { %s22_s27 = ssub.s32 %s1900_s18, %s1976_s25  ;;  %s1804_s30 = scalar_lea.hbm %s2355_s2, 12288 }
   0xd   : > { %p1971_p7 = pnand %p1705_p6, %p2358_p1  ;;  %p1805_p8 = scmp.ne.s32.totalorder %s2355_s2, %s1804_s30 }
   0xe   : > { %p1811_p12 = scmp.lt.u32.totalorder %s1804_s30, %s2355_s2 }
   0xf   : > { %p1806_p9 = pneg %p1971_p7 }
  0x11   : > { %p1807_p10 = pnand %p1806_p9, %p1805_p8 }
  0x13   : > { %p1808_p11 = pneg %p1807_p10 }
  0x15   : > { %p1813_p13 = pnand %p1811_p12, %p1808_p11 }
  0x17   : > { %1816 = shalt.err (!%p1813_p13)
}
  0x18   : > { %s1817_s9 = scalar_lea.vmem %s156_s23, 12288  ;;  %p1825_p6 = scmp.lt.s32.totalorder %s156_s23, %s156_s23 }
  0x19   : > { %p1818_p0 = scmp.ne.s32.totalorder %s156_s23, %s1817_s9  ;;  %p1826_p1 = scmp.lt.s32.totalorder %s1817_s9, %s1817_s9 }
  0x1b   : > { %p1820_p2 = pnand %p1818_p0, %p1806_p9  ;;  %p1827_p4 = por %p1826_p1, %p1825_p6 }
  0x1d   : > { %p1821_p3 = pneg %p1820_p2 }
  0x1f   : > { %p1828_p5 = pnand %p1827_p4, %p1821_p3 }
  0x21   : > { %1831 = shalt.err (!%p1828_p5)
}
  0x22   : > { %s1903_s10 = smov 3072   ;;  %s1904_s11 = smov 192  }
  0x23   : > { %1708 = dma.hbm_to_vmem [thread:$0]  (!%p1971_p7), %s2355_s2, 12288, %s156_s23, [#allocation5], %s1903_s10, %s1903_s10, %s1904_s11  }
  0x24   : > { %p23_p8 = scmp.eq.s32.totalorder %s22_s27, 0  ;;  %p32_p9 = scmp.ne.s32.totalorder %s1896_s17, %s1892_s16 }
  0x25   : > { %p33_p1 = scmp.eq.s32.totalorder %s1900_s18, 0  ;;  %p1714_p4 = scmp.lt.s32.totalorder %s1900_s18, 2 }
  0x26   : > { %s2002_s14 = scalar_select %p23_p8, %s1896_s17, %s25_s26  }
  0x27   : > { %p34_p5 = por %p33_p1, %p32_p9  ;;  %s172_s15 = sand.u32 1, %s1896_s17  }
  0x28   : > { %s1582_s22 = sshll.u32 %s172_s15, 3  ;;  %s1583_s28 = sshll.u32 %s1900_s18, 7 }
  0x29   : > { %s2009_s5 = scalar_lea.hbm %s2353_s0, %s1583_s28  ;;  %s176_s23 = scalar_lea.vmem [#allocation2], %s1582_s22 }
  0x2a   : > { %s183_s24 = sshll.u32 %s176_s23, 4  ;;  %p2013_p7 = pnand %p1714_p4, %p34_p5  ;;  %s2011_s24 = int_to_ptr.vmem [resolvable:$true] %s183_s24 }
  0x2b   : > { %s173_s18 = scalar_lea.sflag [#allocation3], %s172_s15  ;;  %s1832_s27 = scalar_lea.hbm %s2009_s5, 128 }
  0x2c   : > { %p1833_p10 = scmp.ne.s32.totalorder %s2009_s5, %s1832_s27  ;;  %p1834_p11 = pneg %p2013_p7 }
  0x2d   : > { %s1837_s8 = scalar_lea.hbm %s2353_s0, 256  ;;  %p1838_p0 = scmp.lt.u32.totalorder %s2009_s5, %s2353_s0 }
  0x2e   : > { %p1835_p12 = pnand %p1834_p11, %p1833_p10  ;;  %p1839_p2 = scmp.lt.u32.totalorder %s1837_s8, %s1832_s27 }
  0x2f   : > { %p1841_p6 = scmp.lt.u32.totalorder %s1832_s27, %s2009_s5 }
  0x30   : > { %p1836_p13 = pneg %p1835_p12  ;;  %p1840_p3 = por %p1839_p2, %p1838_p0 }
  0x32   : > { %p1842_p8 = por %p1841_p6, %p1840_p3 }
  0x34   : > { %p1843_p9 = pnand %p1842_p8, %p1836_p13 }
  0x36   : > { %1846 = shalt.err (!%p1843_p9)
}
  0x37   : > { %s1847_s11 = scalar_lea.vmem %s2011_s24, 128  ;;  %s1905_s12 = smov [#allocation2]  }
  0x38   : > { %p1848_p1 = scmp.ne.s32.totalorder %s2011_s24, %s1847_s11  ;;  %s1852_s13 = sshll.u32 %s1905_s12, 4  ;;  %s1853_s13 = int_to_ptr.vmem [resolvable:$false] %s1852_s13 }
  0x39   : > { %s1854_s15 = scalar_lea.vmem %s1853_s13, 256  ;;  %p1855_p10 = scmp.lt.s32.totalorder %s2011_s24, %s1853_s13 }
  0x3a   : > { %p1850_p4 = pnand %p1848_p1, %p1834_p11  ;;  %p1856_p12 = scmp.lt.s32.totalorder %s1854_s15, %s1847_s11 }
  0x3c   : > { %p1851_p5 = pneg %p1850_p4  ;;  %p1857_p0 = por %p1856_p12, %p1855_p10 }
  0x3e   : > { %p1858_p2 = pnand %p1857_p0, %p1851_p5 }
  0x40   : > { %1861 = shalt.err (!%p1858_p2)
}
  0x41   : > { %1712 = dma.hbm_to_vmem [thread:$0]  (!%p2013_p7), %s2009_s5, 128, %s2011_s24, %s173_s18  }
  0x42   : > { %p2365_p13 = scmp.ne.s32.totalorder %s2362_s21, 0 }
  0x43   : > { %s201_s22 = sand.u32 (!%p2365_p13), 1, %s1892_s16   ;;  %p2366_p11 = scmp.ne.s32.totalorder (!%p2365_p13), %s2361_s20, 0 }
  0x44   : > { %199 = sbr.rel (%p2365_p13) target bundleno = 410 (0x19a), region = 36  ;;  %s2045_s28 = sshll.u32 (!%p2365_p13), %s201_s22, 3 }
  0x45   : > { %s202_s29 = scalar_lea.sflag (!%p2365_p13), [#allocation3], %s201_s22  ;;  %s205_s30 = scalar_lea.vmem (!%p2365_p13), [#allocation2], %s2045_s28 }
  0x4b   : > { %1879 = dma.done.wait (%p2366_p11), %s202_s29, 128  }
  0x4c   : > { %1881 = vsyncadd (%p2366_p11), %s202_s29, 4294967168  ;;  %p2367_p3 = scmp.eq.s32.totalorder %s1951_s19, 0 }
  0x4e   : > { %1883 = dma.done.wait (%p2367_p3), [#allocation5], 12288   ;;  %p2368_p7 = pmov %p2367_p3 }
  0x4f   : > { %v1906_v0 = vmov 0.0   ;;  %v247_v1 = vld [vmem:[#allocation4 + $0x8] sm:$0xff]  ;;  %v249_v3 = vld [vmem:[#allocation4 + $0x18] sm:$0xff]  ;;  %v246_v6 = vld [vmem:[#allocation4] sm:$0xff]  ;;  %vm468_vm0 = vcmask 261120   ;;  %p237_p6 = scmp.lt.s32.totalorder %s1951_s19, 1 }
  0x50   : > { %1885 = vsyncadd (%p2368_p7), [#allocation5], 4294955008  ;;  %536 = vmatprep.mubr.f32.mxu0 %v1906_v0  ;;  %607 = vmatprep.mubr.f32.mxu1 %v1906_v0  ;;  %v271_v2 = vld [vmem:[#allocation4 + $0xc8] sm:$0xff]  ;;  %v273_v5 = vld [vmem:[#allocation4 + $0xd8] sm:$0xff]  ;;  %vm1325_vm1 = vcmask 31744  }
  0x51   : > { %v1603_v4 = vpack.c.bf16 %v271_v2, %v247_v1  ;;  %v270_v7 = vld [vmem:[#allocation4 + $0xc0] sm:$0xff]  ;;  %v1611_v8 = vpack.c.bf16 %v273_v5, %v249_v3  ;;  %v248_v10 = vld [vmem:[#allocation4 + $0x10] sm:$0xff]  ;;  %v295_v12 = vld [vmem:[#allocation4 + $0x188] sm:$0xff]  ;;  %s2374_s19 = smov (!%p237_p6, %s1951_s19), 1 }
  0x52   : > { %v1605_v9 = vpack.c.bf16 %v270_v7, %v246_v6  ;;  %v272_v11 = vld [vmem:[#allocation4 + $0xd0] sm:$0xff]  ;;  %v319_v14 = vld [vmem:[#allocation4 + $0x248] sm:$0xff]  ;;  %v297_v15 = vld [vmem:[#allocation4 + $0x198] sm:$0xff]  ;;  %s1587_s20 = sshll.u32 %s2374_s19, 3 }
  0x53   : > { %1604 = vmatprep.subr.bf16.mxu0 %v1603_v4  ;;  %v1613_v13 = vpack.c.bf16 %v272_v11, %v248_v10  ;;  %v321_v16 = vld [vmem:[#allocation4 + $0x258] sm:$0xff]  ;;  %1612 = vmatprep.subr.bf16.mxu1 %v1611_v8  ;;  %v1607_v17 = vpack.c.bf16 %v319_v14, %v295_v12  ;;  %v294_v19 = vld [vmem:[#allocation4 + $0x180] sm:$0xff]  ;;  %v296_v21 = vld [vmem:[#allocation4 + $0x190] sm:$0xff]  ;;  %s240_s26 = scalar_lea.vmem %s2354_s1, %s1587_s20  ;;  %s244_s10 = scalar_lea.vmem %s2357_s4, %s1587_s20 }
  0x54   : > { %1606 = vmatpush1.bf16.msra.mxu0 %v1605_v9  ;;  %v1615_v18 = vpack.c.bf16 %v321_v16, %v297_v15  ;;  %v318_v20 = vld [vmem:[#allocation4 + $0x240] sm:$0xff]  ;;  %v320_v23 = vld [vmem:[#allocation4 + $0x250] sm:$0xff]  ;;  %v251_v24 = vld [vmem:[#allocation4 + $0x28] sm:$0xff] }
  0x55   : > { %1614 = vmatpush1.bf16.msra.mxu1 %v1613_v13  ;;  %v1609_v22 = vpack.c.bf16 %v318_v20, %v294_v19  ;;  %1608 = vmatprep.subr.bf16.mxu0 %v1607_v17  ;;  %v1617_v25 = vpack.c.bf16 %v320_v23, %v296_v21  ;;  %v2060_v26 = vld [vmem:[%s205_s30] sm:$0xff]  ;;  %v275_v27 = vld [vmem:[#allocation4 + $0xe8] sm:$0xff]  ;;  %v250_v32 = vld [vmem:[#allocation4 + $0x20] sm:$0xff] }
  0x56   : > { %1616 = vmatprep.subr.bf16.mxu1 %v1615_v18  ;;  %v253_v28 = vld [vmem:[#allocation4 + $0x38] sm:$0xff]  ;;  %v1619_v30 = vpack.c.bf16 %v275_v27, %v251_v24  ;;  %v274_v33 = vld [vmem:[#allocation4 + $0xe0] sm:$0xff]  ;;  %v252_v34 = vld [vmem:[#allocation4 + $0x30] sm:$0xff] }
  0x57   : > { %v277_v29 = vld [vmem:[#allocation4 + $0xf8] sm:$0xff]  ;;  %v1621_v35 = vpack.c.bf16 %v274_v33, %v250_v32  ;;  %v276_v36 = vld [vmem:[#allocation4 + $0xf0] sm:$0xff]  ;;  %v299_v37 = vld [vmem:[#allocation4 + $0x1a8] sm:$0xff] }
  0x58   : > { %v1627_v31 = vpack.c.bf16 %v277_v29, %v253_v28  ;;  %1610 = vmatpush1.bf16.msra.mxu0 %v1609_v22  ;;  %v323_v38 = vld [vmem:[#allocation4 + $0x268] sm:$0xff]  ;;  %v1629_v39 = vpack.c.bf16 %v276_v36, %v252_v34  ;;  %v301_v41 = vld [vmem:[#allocation4 + $0x1b8] sm:$0xff]  ;;  %v298_v43 = vld [vmem:[#allocation4 + $0x1a0] sm:$0xff] }
  0x59   : > { %1618 = vmatpush1.bf16.msra.mxu1 %v1617_v25  ;;  %1620 = vmatprep.subr.bf16.mxu0 %v1619_v30  ;;  %v1623_v40 = vpack.c.bf16 %v323_v38, %v299_v37  ;;  %v325_v42 = vld [vmem:[#allocation4 + $0x278] sm:$0xff]  ;;  %v322_v45 = vld [vmem:[#allocation4 + $0x260] sm:$0xff]  ;;  %v300_v46 = vld [vmem:[#allocation4 + $0x1b0] sm:$0xff] }
  0x5a   : > { %1628 = vmatprep.subr.bf16.mxu1 %v1627_v31  ;;  %v1631_v44 = vpack.c.bf16 %v325_v42, %v301_v41  ;;  %v324_v47 = vld [vmem:[#allocation4 + $0x270] sm:$0xff]  ;;  %v255_v48 = vld [vmem:[#allocation4 + $0x48] sm:$0xff]  ;;  %v257_v50 = vld [vmem:[#allocation4 + $0x58] sm:$0xff]  ;;  %v1625_v51 = vpack.c.bf16 %v322_v45, %v298_v43 }
  0x5b   : > { %1589 = vmatmul.mubr.msk.f32.vlgmr.msra.gmra.mrb[0].mxu0 %vm468_vm0, %v2060_v26  ;;  %v279_v49 = vld [vmem:[#allocation4 + $0x108] sm:$0xff]  ;;  %v281_v52 = vld [vmem:[#allocation4 + $0x118] sm:$0xff]  ;;  %v1633_v53 = vpack.c.bf16 %v324_v47, %v300_v46  ;;  %v254_v55 = vld [vmem:[#allocation4 + $0x40] sm:$0xff] }
  0x5c   : > { %1590 = vmatmul.mubr.msk.f32.vlgmr.msra.gmra.mrb[0].mxu1 %vm468_vm0, %v2060_v26  ;;  %1622 = vmatpush1.bf16.msra.mxu0 %v1621_v35  ;;  %v1635_v54 = vpack.c.bf16 %v279_v49, %v255_v48  ;;  %v278_v56 = vld [vmem:[#allocation4 + $0x100] sm:$0xff]  ;;  %v256_v57 = vld [vmem:[#allocation4 + $0x50] sm:$0xff]  ;;  %v1643_v58 = vpack.c.bf16 %v281_v52, %v257_v50  ;;  %v303_v60 = vld [vmem:[#allocation4 + $0x1c8] sm:$0xff] }
  0x5d   : > { %1630 = vmatpush1.bf16.msra.mxu1 %v1629_v39  ;;  %1624 = vmatprep.subr.bf16.mxu0 %v1623_v40  ;;  %v280_v59 = vld [vmem:[#allocation4 + $0x110] sm:$0xff]  ;;  %v327_v61 = vld [vmem:[#allocation4 + $0x288] sm:$0xff]  ;;  %v305_v62 = vld [vmem:[#allocation4 + $0x1d8] sm:$0xff]  ;;  %v1637_v1 = vpack.c.bf16 %v278_v56, %v254_v55 }
  0x5e   : > { %1632 = vmatprep.subr.bf16.mxu1 %v1631_v44  ;;  %678 = vmatprep.mubr.f32.mxu0 %v1906_v0  ;;  %v329_v63 = vld [vmem:[#allocation4 + $0x298] sm:$0xff]  ;;  %v1645_v2 = vpack.c.bf16 %v280_v59, %v256_v57  ;;  %v1639_v3 = vpack.c.bf16 %v327_v61, %v303_v60  ;;  %v302_v4 = vld [vmem:[#allocation4 + $0x1c0] sm:$0xff]  ;;  %v304_v6 = vld [vmem:[#allocation4 + $0x1d0] sm:$0xff] }
  0x5f   : > { %749 = vmatprep.mubr.f32.mxu1 %v1906_v0  ;;  %v326_v5 = vld [vmem:[#allocation4 + $0x280] sm:$0xff]  ;;  %v1647_v7 = vpack.c.bf16 %v329_v63, %v305_v62  ;;  %v328_v8 = vld [vmem:[#allocation4 + $0x290] sm:$0xff]  ;;  %v259_v9 = vld [vmem:[#allocation4 + $0x68] sm:$0xff] }
  0x60   : > { %1626 = vmatpush1.bf16.msra.mxu0 %v1625_v51  ;;  %v283_v10 = vld [vmem:[#allocation4 + $0x128] sm:$0xff]  ;;  %v261_v11 = vld [vmem:[#allocation4 + $0x78] sm:$0xff]  ;;  %v1641_v13 = vpack.c.bf16 %v326_v5, %v302_v4  ;;  %v1649_v14 = vpack.c.bf16 %v328_v8, %v304_v6  ;;  %v258_v16 = vld [vmem:[#allocation4 + $0x60] sm:$0xff] }
  0x61   : > { %1634 = vmatpush1.bf16.msra.mxu1 %v1633_v53  ;;  %1636 = vmatprep.subr.bf16.mxu0 %v1635_v54  ;;  %v285_v12 = vld [vmem:[#allocation4 + $0x138] sm:$0xff]  ;;  %v1651_v15 = vpack.c.bf16 %v283_v10, %v259_v9  ;;  %v282_v17 = vld [vmem:[#allocation4 + $0x120] sm:$0xff]  ;;  %v260_v18 = vld [vmem:[#allocation4 + $0x70] sm:$0xff] }
  0x62   : > { %1644 = vmatprep.subr.bf16.mxu1 %v1643_v58  ;;  %v1659_v19 = vpack.c.bf16 %v285_v12, %v261_v11  ;;  %v284_v20 = vld [vmem:[#allocation4 + $0x130] sm:$0xff]  ;;  %v307_v21 = vld [vmem:[#allocation4 + $0x1e8] sm:$0xff]  ;;  %v309_v23 = vld [vmem:[#allocation4 + $0x1f8] sm:$0xff]  ;;  %v1653_v25 = vpack.c.bf16 %v282_v17, %v258_v16 }
  0x63   : > { %1591 = vmatmul.mubr.msk.f32.vlgmr.msra.gmra.mrb[2].mxu0 %vm468_vm0, %v2060_v26  ;;  %v331_v22 = vld [vmem:[#allocation4 + $0x2a8] sm:$0xff]  ;;  %v333_v24 = vld [vmem:[#allocation4 + $0x2b8] sm:$0xff]  ;;  %v1661_v27 = vpack.c.bf16 %v284_v20, %v260_v18  ;;  %v306_v29 = vld [vmem:[#allocation4 + $0x1e0] sm:$0xff] }
  0x64   : > { %1592 = vmatmul.mubr.msk.f32.vlgmr.msra.gmra.mrb[2].mxu1 %vm468_vm0, %v2060_v26  ;;  %1638 = vmatpush1.bf16.msra.mxu0 %v1637_v1  ;;  %v1655_v28 = vpack.c.bf16 %v331_v22, %v307_v21  ;;  %v330_v30 = vld [vmem:[#allocation4 + $0x2a0] sm:$0xff]  ;;  %v308_v31 = vld [vmem:[#allocation4 + $0x1f0] sm:$0xff]  ;;  %v1663_v32 = vpack.c.bf16 %v333_v24, %v309_v23  ;;  %v263_v34 = vld [vmem:[#allocation4 + $0x88] sm:$0xff] }
  0x65   : > { %1646 = vmatpush1.bf16.msra.mxu1 %v1645_v2  ;;  %1640 = vmatprep.subr.bf16.mxu0 %v1639_v3  ;;  %v332_v33 = vld [vmem:[#allocation4 + $0x2b0] sm:$0xff]  ;;  %v287_v35 = vld [vmem:[#allocation4 + $0x148] sm:$0xff]  ;;  %v265_v36 = vld [vmem:[#allocation4 + $0x98] sm:$0xff]  ;;  %v1657_v38 = vpack.c.bf16 %v330_v30, %v306_v29 }
  0x66   : > { %1648 = vmatprep.subr.bf16.mxu1 %v1647_v7  ;;  %820 = vmatprep.mubr.f32.mxu0 %v1906_v0  ;;  %v289_v37 = vld [vmem:[#allocation4 + $0x158] sm:$0xff]  ;;  %v1665_v39 = vpack.c.bf16 %v332_v33, %v308_v31  ;;  %v1667_v40 = vpack.c.bf16 %v287_v35, %v263_v34  ;;  %v262_v41 = vld [vmem:[#allocation4 + $0x80] sm:$0xff]  ;;  %v311_v43 = vld [vmem:[#allocation4 + $0x208] sm:$0xff] }
  0x67   : > { %891 = vmatprep.mubr.f32.mxu1 %v1906_v0  ;;  %v286_v42 = vld [vmem:[#allocation4 + $0x140] sm:$0xff]  ;;  %v335_v44 = vld [vmem:[#allocation4 + $0x2c8] sm:$0xff]  ;;  %v1675_v45 = vpack.c.bf16 %v289_v37, %v265_v36  ;;  %v264_v46 = vld [vmem:[#allocation4 + $0x90] sm:$0xff] }
  0x68   : > { %1642 = vmatpush1.bf16.msra.mxu0 %v1641_v13  ;;  %v288_v47 = vld [vmem:[#allocation4 + $0x150] sm:$0xff]  ;;  %v313_v48 = vld [vmem:[#allocation4 + $0x218] sm:$0xff]  ;;  %v1669_v50 = vpack.c.bf16 %v286_v42, %v262_v41  ;;  %v1671_v51 = vpack.c.bf16 %v335_v44, %v311_v43  ;;  %v310_v52 = vld [vmem:[#allocation4 + $0x200] sm:$0xff] }
  0x69   : > { %1650 = vmatpush1.bf16.msra.mxu1 %v1649_v14  ;;  %1652 = vmatprep.subr.bf16.mxu0 %v1651_v15  ;;  %v337_v49 = vld [vmem:[#allocation4 + $0x2d8] sm:$0xff]  ;;  %v334_v53 = vld [vmem:[#allocation4 + $0x2c0] sm:$0xff]  ;;  %v1677_v54 = vpack.c.bf16 %v288_v47, %v264_v46  ;;  %v267_v55 = vld [vmem:[#allocation4 + $0xa8] sm:$0xff] }
  0x6a   : > { %1660 = vmatprep.subr.bf16.mxu1 %v1659_v19  ;;  %v1679_v56 = vpack.c.bf16 %v337_v49, %v313_v48  ;;  %v291_v57 = vld [vmem:[#allocation4 + $0x168] sm:$0xff]  ;;  %v312_v58 = vld [vmem:[#allocation4 + $0x210] sm:$0xff]  ;;  %v269_v60 = vld [vmem:[#allocation4 + $0xb8] sm:$0xff]  ;;  %v1673_v62 = vpack.c.bf16 %v334_v53, %v310_v52 }
  0x6b   : > { %1593 = vmatmul.mubr.msk.f32.vlgmr.msra.gmra.mrb[4].mxu0 %vm468_vm0, %v2060_v26  ;;  %v336_v59 = vld [vmem:[#allocation4 + $0x2d0] sm:$0xff]  ;;  %v293_v61 = vld [vmem:[#allocation4 + $0x178] sm:$0xff]  ;;  %v1683_v63 = vpack.c.bf16 %v291_v57, %v267_v55  ;;  %v266_v2 = vld [vmem:[#allocation4 + $0xa0] sm:$0xff] }
  0x6c   : > { %1594 = vmatmul.mubr.msk.f32.vlgmr.msra.gmra.mrb[4].mxu1 %vm468_vm0, %v2060_v26  ;;  %1654 = vmatpush1.bf16.msra.mxu0 %v1653_v25  ;;  %v1681_v1 = vpack.c.bf16 %v336_v59, %v312_v58  ;;  %v290_v3 = vld [vmem:[#allocation4 + $0x160] sm:$0xff]  ;;  %v315_v4 = vld [vmem:[#allocation4 + $0x228] sm:$0xff]  ;;  %v1691_v6 = vpack.c.bf16 %v293_v61, %v269_v60  ;;  %v268_v7 = vld [vmem:[#allocation4 + $0xb0] sm:$0xff]  ;;  %v348_v25 = vlaneseq }
  0x6d   : > { %1662 = vmatpush1.bf16.msra.mxu1 %v1661_v27  ;;  %1656 = vmatprep.subr.bf16.mxu0 %v1655_v28  ;;  %v339_v5 = vld [vmem:[#allocation4 + $0x2e8] sm:$0xff]  ;;  %v292_v8 = vld [vmem:[#allocation4 + $0x170] sm:$0xff]  ;;  %v317_v9 = vld [vmem:[#allocation4 + $0x238] sm:$0xff]  ;;  %v1685_v11 = vpack.c.bf16 %v290_v3, %v266_v2 }
  0x6e   : > { %1664 = vmatprep.subr.bf16.mxu1 %v1663_v32  ;;  %962 = vmatprep.mubr.f32.mxu0 %v1906_v0  ;;  %v341_v10 = vld [vmem:[#allocation4 + $0x2f8] sm:$0xff]  ;;  %v1687_v12 = vpack.c.bf16 %v339_v5, %v315_v4  ;;  %v314_v13 = vld [vmem:[#allocation4 + $0x220] sm:$0xff]  ;;  %v1693_v15 = vpack.c.bf16 %v292_v8, %v268_v7  ;;  %v316_v17 = vld [vmem:[#allocation4 + $0x230] sm:$0xff] }
  0x6f   : > { %1033 = vmatprep.mubr.f32.mxu1 %v1906_v0  ;;  %v338_v14 = vld [vmem:[#allocation4 + $0x2e0] sm:$0xff]  ;;  %v1695_v16 = vpack.c.bf16 %v341_v10, %v317_v9  ;;  %v340_v18 = vld [vmem:[#allocation4 + $0x2f0] sm:$0xff]  ;;  %v2120_v30 = vld [vmem:[%s2356_s3 + $0x8] sm:$0xff] }
  0x70   : > { %1658 = vmatpush1.bf16.msra.mxu0 %v1657_v38  ;;  %v1689_v19 = vpack.c.bf16 %v338_v14, %v314_v13  ;;  %v1697_v20 = vpack.c.bf16 %v340_v18, %v316_v17  ;;  %v2140_v36 = vld [vmem:[%s2356_s3] sm:$0xff]  ;;  %v2186_v2 = vld [vmem:[%s2356_s3 + $0x10] sm:$0xff] }
  0x71   : > { %1666 = vmatpush1.bf16.msra.mxu1 %v1665_v39  ;;  %1668 = vmatprep.subr.bf16.mxu0 %v1667_v40  ;;  %v1324_v39 = vld [vmem:[%s240_s26] sm:$0xff] }
  0x72   : > { %1676 = vmatprep.subr.bf16.mxu1 %v1675_v45  ;;  %v2157_v48 = vsel %vm1325_vm1, %v1324_v39, 0.0 }
  0x73   : > { %1595 = vmatmul.mubr.msk.f32.vlgmr.msra.gmra.mrb[6].mxu0 %vm468_vm0, %v2060_v26 }
  0x74   : > { %1596 = vmatmul.mubr.msk.f32.vlgmr.msra.gmra.mrb[6].mxu1 %vm468_vm0, %v2060_v26  ;;  %1670 = vmatpush1.bf16.msra.mxu0 %v1669_v50 }
  0x75   : > { %1672 = vmatprep.subr.bf16.mxu0 %v1671_v51  ;;  %1678 = vmatpush1.bf16.msra.mxu1 %v1677_v54 }
  0x76   : > { %1104 = vmatprep.mubr.f32.mxu0 %v1906_v0  ;;  %1680 = vmatprep.subr.bf16.mxu1 %v1679_v56 }
  0x77   : > { %1175 = vmatprep.mubr.f32.mxu1 %v1906_v0 }
  0x78   : > { %1674 = vmatpush1.bf16.msra.mxu0 %v1673_v62 }
  0x79   : > { %1684 = vmatprep.subr.bf16.mxu0 %v1683_v63  ;;  %1682 = vmatpush1.bf16.msra.mxu1 %v1681_v1 }
  0x7a   : > { %1692 = vmatprep.subr.bf16.mxu1 %v1691_v6 }
  0x7b   : > { %1597 = vmatmul.mubr.msk.f32.vlgmr.msra.gmra.mrb[8].mxu0 %vm468_vm0, %v2060_v26 }
  0x7c   : > { %1686 = vmatpush1.bf16.msra.mxu0 %v1685_v11  ;;  %1598 = vmatmul.mubr.msk.f32.vlgmr.msra.gmra.mrb[8].mxu1 %vm468_vm0, %v2060_v26 }
  0x7d   : > { %1688 = vmatprep.subr.bf16.mxu0 %v1687_v12  ;;  %1694 = vmatpush1.bf16.msra.mxu1 %v1693_v15 }
  0x7e   : > { %1246 = vmatprep.mubr.f32.mxu0 %v1906_v0  ;;  %1696 = vmatprep.subr.bf16.mxu1 %v1695_v16 }
  0x7f   : > { %1317 = vmatprep.mubr.f32.mxu1 %v1906_v0  ;;  %v349_v0 = vshrl.u32 %v348_v25, 7 }
  0x80   : > { %1690 = vmatpush1.bf16.msra.mxu0 %v1689_v19 }
  0x81   : > { %1698 = vmatpush1.bf16.msra.mxu1 %v1697_v20  ;;  %v2122_v31 = vsub.s32 0, %v349_v0  ;;  %v2129_v32 = vsub.s32 1, %v349_v0  ;;  %v2131_v33 = vsub.s32 2, %v349_v0  ;;  %v2133_v34 = vsub.s32 3, %v349_v0 }
  0x82   : > { %v2152_v44 = vsub.s32 4, %v349_v0  ;;  %v2167_v54 = vsub.s32 5, %v349_v0  ;;  %v2172_v57 = vsub.s32 6, %v349_v0  ;;  %v2174_v58 = vsub.s32 7, %v349_v0 }
  0x83   : > { %1599 = vmatmul.mubr.msk.f32.vlgmr.msra.gmra.mrb[10].mxu0 %vm468_vm0, %v2060_v26  ;;  %v383_v35 = vrot.slane %v2120_v30, %v2122_v31  ;;  %v391_v37 = vrot.slane %v2120_v30, %v2131_v33  ;;  %v387_v38 = vrot.slane %v2120_v30, %v2129_v32  ;;  %v395_v40 = vrot.slane %v2120_v30, %v2133_v34 }
  0x84   : > { %1600 = vmatmul.mubr.msk.f32.vlgmr.msra.gmra.mrb[10].mxu1 %vm468_vm0, %v2060_v26  ;;  %v351_v42 = vrot.slane %v2140_v36, %v2122_v31  ;;  %v355_v43 = vrot.slane %v2140_v36, %v2129_v32  ;;  %v359_v49 = vrot.slane %v2140_v36, %v2131_v33  ;;  %v363_v53 = vrot.slane %v2140_v36, %v2133_v34 }
  0x85   : > { %v367_v61 = vrot.slane %v2140_v36, %v2152_v44  ;;  %v399_v1 = vrot.slane %v2120_v30, %v2152_v44  ;;  %v407_v5 = vrot.slane %v2120_v30, %v2172_v57  ;;  %v403_v6 = vrot.slane %v2120_v30, %v2167_v54 }
  0x86   : > { %v371_v7 = vrot.slane %v2140_v36, %v2167_v54  ;;  %v411_v9 = vrot.slane %v2120_v30, %v2174_v58  ;;  %v375_v10 = vrot.slane %v2140_v36, %v2172_v57  ;;  %v379_v11 = vrot.slane %v2140_v36, %v2174_v58 }
  0x87   : > { %v415_v13 = vrot.slane %v2186_v2, %v2122_v31  ;;  %v419_v17 = vrot.slane %v2186_v2, %v2129_v32  ;;  %v423_v18 = vrot.slane %v2186_v2, %v2131_v33  ;;  %v427_v0 = vrot.slane %v2186_v2, %v2133_v34 }
  0x88   : > { %v431_v32 = vrot.slane %v2186_v2, %v2152_v44 }
 0x12e   : > { %v2096_v21 = vpop.f32.mrb[0].mxu0 }
 0x12f   : > { %v2099_v22 = vpop.f32.mrb[1].mxu0  ;;  %v2101_v23 = vpop.f32.mrb[0].mxu1  ;;  %v539_v30 = vadd.f32 %v2096_v21, %v351_v42  ;;  %v435_v21 = vrot.slane %v2186_v2, %v2167_v54 }
 0x130   : > { %v2103_v24 = vpop.f32.mrb[1].mxu1  ;;  %v541_v33 = vadd.f32 %v2099_v22, %v355_v43  ;;  %v610_v36 = vadd.f32 %v2101_v23, %v359_v49  ;;  %v443_v22 = vrot.slane %v2186_v2, %v2174_v58 }
 0x131   : > { %v1327_v49 = vsub.f32 %v2157_v48, %v539_v30 }
 0x136   : > { %v2108_v27 = vpop.f32.mrb[2].mxu0 }
 0x137   : > { %v2111_v28 = vpop.f32.mrb[3].mxu0  ;;  %v2113_v26 = vpop.f32.mrb[2].mxu1  ;;  %v681_v23 = vadd.f32 %v2108_v27, %v367_v61 }
 0x138   : > { %v2115_v29 = vpop.f32.mrb[3].mxu1  ;;  %v2234_v43 = vadd.f32 %v2111_v28, %v371_v7 }
 0x13e   : > { %v822_v41 = vpop.f32.mrb[4].mxu0 }
 0x13f   : > { %v2154_v45 = vadd.f32 %v822_v41, %v383_v35  ;;  %v893_v46 = vpop.f32.mrb[4].mxu1  ;;  %v824_v47 = vpop.f32.mrb[5].mxu0  ;;  %v612_v41 = vadd.f32 %v2103_v24, %v363_v53 }
 0x140   : > { %v2161_v50 = vadd.f32 %v893_v46, %v391_v37  ;;  %v2163_v51 = vadd.f32 %v824_v47, %v387_v38  ;;  %v895_v52 = vpop.f32.mrb[5].mxu1 }
 0x141   : > { %v1328_v55 = vsub.f32 0.0, %v2154_v45  ;;  %v2170_v56 = vadd.f32 %v895_v52, %v395_v40  ;;  %v439_v40 = vrot.slane %v2186_v2, %v2172_v57  ;;  %v1337_v52 = vsub.f32 %v2157_v48, %v541_v33 }
 0x142   : > { %v1348_v59 = vsub.f32 0.0, %v2161_v50  ;;  %v1338_v60 = vsub.f32 0.0, %v2163_v51  ;;  %v1352_v33 = vsub.f32 -0.9189385, %v2161_v50 }
 0x143   : > { %v1329_v62 = vmul.f32 1.442695, %v1328_v55  ;;  %v1358_v63 = vsub.f32 0.0, %v2170_v56  ;;  %v1347_v55 = vsub.f32 %v2157_v48, %v610_v36 }
 0x144   : > { %v1349_v3 = vmul.f32 1.442695, %v1348_v59  ;;  %v1339_v4 = vmul.f32 1.442695, %v1338_v60  ;;  %v752_v59 = vadd.f32 %v2113_v26, %v375_v10  ;;  %v2241_v60 = vadd.f32 %v2115_v29, %v379_v11 }
 0x145   : > { %1752 = vpow2.f32 %v1329_v62  ;;  %v1359_v8 = vmul.f32 1.442695, %v1358_v63  ;;  %v1367_v26 = vsub.f32 %v2157_v48, %v681_v23  ;;  %v1377_v29 = vsub.f32 %v2157_v48, %v2234_v43 }
 0x146   : > { %1754 = vpow2.f32 %v1349_v3  ;;  %v964_v12 = vpop.f32.mrb[6].mxu0 }
 0x147   : > { %1756 = vpow2.f32 %v1339_v4  ;;  %v2202_v14 = vadd.f32 %v964_v12, %v399_v1  ;;  %v1035_v15 = vpop.f32.mrb[6].mxu1  ;;  %v966_v16 = vpop.f32.mrb[7].mxu0 }
 0x148   : > { %1758 = vpow2.f32 %v1359_v8  ;;  %v2208_v19 = vadd.f32 %v1035_v15, %v407_v5  ;;  %v2210_v20 = vadd.f32 %v966_v16, %v403_v6  ;;  %v1037_v25 = vpop.f32.mrb[7].mxu1  ;;  %v1357_v6 = vsub.f32 %v2157_v48, %v612_v41 }
 0x149   : > { %v1368_v31 = vsub.f32 0.0, %v2202_v14  ;;  %v2216_v35 = vadd.f32 %v1037_v25, %v411_v9  ;;  %v1397_v15 = vsub.f32 %v2157_v48, %v2241_v60  ;;  %v1372_v23 = vsub.f32 -0.9189385, %v2202_v14 }
 0x14a   : > { %v1388_v37 = vsub.f32 0.0, %v2208_v19  ;;  %v1378_v38 = vsub.f32 0.0, %v2210_v20 }
 0x14b   : > { %v1369_v39 = vmul.f32 1.442695, %v1368_v31  ;;  %v1398_v34 = vsub.f32 0.0, %v2216_v35 }
 0x14c   : > { %v1389_v42 = vmul.f32 1.442695, %v1388_v37  ;;  %v1379_v46 = vmul.f32 1.442695, %v1378_v38  ;;  %v1342_v37 = vsub.f32 -0.9189385, %v2163_v51 }
 0x14d   : > { %1760 = vpow2.f32 %v1369_v39  ;;  %v1399_v47 = vmul.f32 1.442695, %v1398_v34  ;;  %v1362_v34 = vsub.f32 -0.9189385, %v2170_v56 }
 0x14e   : > { %1762 = vpow2.f32 %v1389_v42  ;;  %v1106_v24 = vpop.f32.mrb[8].mxu0 }
 0x14f   : > { %v1753_v53 = vpop.eup %1752  ;;  %1764 = vpow2.f32 %v1379_v46  ;;  %v2243_v27 = vadd.f32 %v1106_v24, %v415_v13  ;;  %v1108_v28 = vpop.f32.mrb[9].mxu0  ;;  %v1387_v13 = vsub.f32 %v2157_v48, %v752_v59 }
 0x150   : > { %v1177_v61 = vpop.f32.mrb[8].mxu1  ;;  %v1755_v62 = vpop.eup %1754  ;;  %v1331_v63 = vmul.f32 %v1753_v53, %v1327_v49  ;;  %1766 = vpow2.f32 %v1399_v47  ;;  %v2245_v1 = vadd.f32 %v1108_v28, %v419_v17 }
 0x151   : > { %v2247_v3 = vadd.f32 %v1177_v61, %v423_v18  ;;  %v1179_v4 = vpop.f32.mrb[9].mxu1  ;;  %v1757_v5 = vpop.eup %1756  ;;  %v1351_v7 = vmul.f32 %v1755_v62, %v1347_v55  ;;  %v1332_v18 = vsub.f32 -0.9189385, %v2154_v45 }
 0x152   : > { %v1759_v8 = vpop.eup %1758  ;;  %v1333_v9 = vmul.f32 0.5, %v1331_v63  ;;  %v1341_v10 = vmul.f32 %v1757_v5, %v1337_v52  ;;  %v1408_v11 = vmax.f32 %v2243_v27, %v2245_v1  ;;  %v2255_v12 = vadd.f32 %v1179_v4, %v427_v0 }
 0x153   : > { %v1353_v16 = vmul.f32 0.5, %v1351_v7  ;;  %v1361_v17 = vmul.f32 %v1759_v8, %v1357_v6  ;;  %v1392_v8 = vsub.f32 -0.9189385, %v2208_v19 }
 0x154   : > { %v1334_v25 = vmul.f32 %v1333_v9, %v1331_v63  ;;  %v1343_v30 = vmul.f32 0.5, %v1341_v10  ;;  %v1410_v31 = vmax.f32 %v1408_v11, %v2247_v3  ;;  %v1382_v11 = vsub.f32 -0.9189385, %v2210_v20 }
 0x155   : > { %v1354_v36 = vmul.f32 %v1353_v16, %v1351_v7  ;;  %v1363_v0 = vmul.f32 0.5, %v1361_v17 }
 0x156   : > { %v1335_v38 = vsub.f32 %v1332_v18, %v1334_v25  ;;  %v1344_v39 = vmul.f32 %v1343_v30, %v1341_v10  ;;  %v1412_v48 = vmax.f32 %v1410_v31, %v2255_v12  ;;  %v1248_v41 = vpop.f32.mrb[10].mxu0 }
 0x157   : > { %v1761_v42 = vpop.eup %1760  ;;  %v1355_v46 = vsub.f32 %v1352_v33, %v1354_v36  ;;  %v1364_v45 = vmul.f32 %v1363_v0, %v1361_v17  ;;  %v2270_v50 = vadd.f32 %v1248_v41, %v431_v32  ;;  %v1250_v43 = vpop.f32.mrb[11].mxu0  ;;  %v1402_v17 = vsub.f32 -0.9189385, %v2216_v35 }
 0x158   : > { %v1319_v51 = vpop.f32.mrb[10].mxu1  ;;  %v1763_v47 = vpop.eup %1762  ;;  %v1345_v49 = vsub.f32 %v1342_v37, %v1344_v39  ;;  %v1371_v52 = vmul.f32 %v1761_v42, %v1367_v26  ;;  %v2273_v56 = vadd.f32 %v1335_v38, %v2243_v27  ;;  %v1251_v55 = vadd.f32 %v1250_v43, %v435_v21 }
 0x159   : > { %v1321_v24 = vpop.f32.mrb[11].mxu1  ;;  %v1765_v53 = vpop.eup %1764  ;;  %v1365_v14 = vsub.f32 %v1362_v34, %v1364_v45  ;;  %v1391_v59 = vmul.f32 %v1763_v47, %v1387_v13  ;;  %v2279_v44 = vadd.f32 %v1355_v46, %v2247_v3  ;;  %v1414_v32 = vmax.f32 %v1412_v48, %v2270_v50 }
 0x15a   : > { %v1767_v60 = vpop.eup %1766  ;;  %v1373_v28 = vmul.f32 0.5, %v1371_v52  ;;  %v1381_v61 = vmul.f32 %v1765_v53, %v1377_v29  ;;  %v1346_v62 = vadd.f32 %v1345_v49, %v2245_v1  ;;  %v1320_v63 = vadd.f32 %v1319_v51, %v439_v40 }
 0x15b   : > { %v1393_v54 = vmul.f32 0.5, %v1391_v59  ;;  %v1401_v21 = vmul.f32 %v1767_v60, %v1397_v15  ;;  %v2287_v4 = vadd.f32 %v1365_v14, %v2255_v12  ;;  %v1416_v5 = vmax.f32 %v1414_v32, %v1251_v55 }
 0x15c   : > { %v1374_v6 = vmul.f32 %v1373_v28, %v1371_v52  ;;  %v1383_v26 = vmul.f32 0.5, %v1381_v61  ;;  %v1407_v7 = vmax.f32 %v2273_v56, %v1346_v62  ;;  %v2293_v29 = vadd.f32 %v1321_v24, %v443_v22 }
 0x15d   : > { %v1394_v9 = vmul.f32 %v1393_v54, %v1391_v59  ;;  %v1403_v57 = vmul.f32 0.5, %v1401_v21  ;;  %v1418_v40 = vmax.f32 %v1416_v5, %v1320_v63 }
 0x15e   : > { %v1375_v10 = vsub.f32 %v1372_v23, %v1374_v6  ;;  %v1384_v13 = vmul.f32 %v1383_v26, %v1381_v61  ;;  %v1409_v15 = vmax.f32 %v1407_v7, %v2279_v44 }
 0x15f   : > { %v1395_v16 = vsub.f32 %v1392_v8, %v1394_v9  ;;  %v1404_v18 = vmul.f32 %v1403_v57, %v1401_v21  ;;  %v2300_v25 = vmax.f32 %v1418_v40, %v2293_v29 }
 0x160   : > { %v1385_v58 = vsub.f32 %v1382_v11, %v1384_v13  ;;  %v1411_v2 = vmax.f32 %v1409_v15, %v2287_v4  ;;  %v1376_v19 = vadd.f32 %v1375_v10, %v2270_v50 }
 0x161   : > { %v1405_v22 = vsub.f32 %v1402_v17, %v1404_v18  ;;  %v1396_v30 = vadd.f32 %v1395_v16, %v1320_v63  ;;  %v1424_v20 = vsub.f32 %v2243_v27, %v2300_v25  ;;  %v1431_v31 = vsub.f32 %v2245_v1, %v2300_v25 }
 0x162   : > { %v1413_v33 = vmax.f32 %v1411_v2, %v1376_v19  ;;  %v1386_v36 = vadd.f32 %v1385_v58, %v1251_v55  ;;  %v1439_v35 = vsub.f32 %v2247_v3, %v2300_v25  ;;  %v1447_v37 = vsub.f32 %v2255_v12, %v2300_v25 }
 0x163   : > { %v1406_v0 = vadd.f32 %v1405_v22, %v2293_v29  ;;  %v1425_v38 = vmul.f32 1.442695, %v1424_v20  ;;  %v1432_v39 = vmul.f32 1.442695, %v1431_v31  ;;  %v1455_v34 = vsub.f32 %v2270_v50, %v2300_v25 }
 0x164   : > { %v1415_v48 = vmax.f32 %v1413_v33, %v1386_v36  ;;  %v1440_v27 = vmul.f32 1.442695, %v1439_v35  ;;  %v1463_v41 = vsub.f32 %v1251_v55, %v2300_v25  ;;  %v1448_v1 = vmul.f32 1.442695, %v1447_v37 }
 0x165   : > { %1768 = vpow2.f32 %v1425_v38  ;;  %v1471_v42 = vsub.f32 %v1320_v63, %v2300_v25  ;;  %v1479_v3 = vsub.f32 %v2293_v29, %v2300_v25  ;;  %v1456_v45 = vmul.f32 1.442695, %v1455_v34 }
 0x166   : > { %v1417_v46 = vmax.f32 %v1415_v48, %v1396_v30  ;;  %1770 = vpow2.f32 %v1432_v39  ;;  %v1464_v23 = vmul.f32 1.442695, %v1463_v41 }
 0x167   : > { %1772 = vpow2.f32 %v1440_v27  ;;  %v1472_v14 = vmul.f32 1.442695, %v1471_v42  ;;  %v1480_v63 = vmul.f32 1.442695, %v1479_v3 }
 0x168   : > { %v2319_v12 = vmax.f32 %v1417_v46, %v1406_v0  ;;  %1774 = vpow2.f32 %v1448_v1 }
 0x169   : > { %1776 = vpow2.f32 %v1456_v45 }
 0x16a   : > { %v1421_v50 = vsub.f32 %v2273_v56, %v2319_v12  ;;  %v1427_v43 = vsub.f32 %v1346_v62, %v2319_v12  ;;  %v1435_v51 = vsub.f32 %v2279_v44, %v2319_v12  ;;  %v1443_v47 = vsub.f32 %v2287_v4, %v2319_v12 }
 0x16b   : > { %v1451_v49 = vsub.f32 %v1376_v19, %v2319_v12  ;;  %v1459_v52 = vsub.f32 %v1386_v36, %v2319_v12  ;;  %v1467_v55 = vsub.f32 %v1396_v30, %v2319_v12  ;;  %1778 = vpow2.f32 %v1464_v23 }
 0x16c   : > { %v1422_v24 = vmul.f32 1.442695, %v1421_v50  ;;  %v1428_v53 = vmul.f32 1.442695, %v1427_v43  ;;  %v1436_v59 = vmul.f32 1.442695, %v1435_v51  ;;  %v1475_v56 = vsub.f32 %v1406_v0, %v2319_v12 }
 0x16d   : > { %v1444_v44 = vmul.f32 1.442695, %v1443_v47  ;;  %v1452_v61 = vmul.f32 1.442695, %v1451_v49  ;;  %v1460_v4 = vmul.f32 1.442695, %v1459_v52 }
 0x16e   : > { %1780 = vpow2.f32 %v1422_v24  ;;  %v1468_v6 = vmul.f32 1.442695, %v1467_v55  ;;  %v1476_v8 = vmul.f32 1.442695, %v1475_v56 }
 0x16f   : > { %v1769_v32 = vpop.eup %1768  ;;  %1782 = vpow2.f32 %v1428_v53 }
 0x170   : > { %v1771_v60 = vpop.eup %1770  ;;  %1784 = vpow2.f32 %v1472_v14 }
 0x171   : > { %v1434_v28 = vadd.f32 %v1771_v60, %v1769_v32  ;;  %1786 = vpow2.f32 %v1436_v59  ;;  %v1773_v62 = vpop.eup %1772 }
 0x172   : > { %v1775_v54 = vpop.eup %1774  ;;  %1788 = vpow2.f32 %v1444_v44 }
 0x173   : > { %v1442_v21 = vadd.f32 %v1773_v62, %v1434_v28  ;;  %1790 = vpow2.f32 %v1452_v61  ;;  %v1777_v26 = vpop.eup %1776 }
 0x174   : > { %1792 = vpow2.f32 %v1480_v63 }
 0x175   : > { %v1450_v5 = vadd.f32 %v1775_v54, %v1442_v21  ;;  %v1779_v7 = vpop.eup %1778  ;;  %1794 = vpow2.f32 %v1460_v4 }
 0x176   : > { %1796 = vpow2.f32 %v1468_v6 }
 0x177   : > { %v1458_v29 = vadd.f32 %v1777_v26, %v1450_v5  ;;  %1798 = vpow2.f32 %v1476_v8 }
 0x178   : > { %v1781_v9 = vpop.eup %1780 }
 0x179   : > { %v1783_v57 = vpop.eup %1782  ;;  %v1466_v40 = vadd.f32 %v1779_v7, %v1458_v29 }
 0x17a   : > { %v1785_v10 = vpop.eup %1784  ;;  %v1430_v11 = vadd.f32 %v1783_v57, %v1781_v9 }
 0x17b   : > { %v1787_v13 = vpop.eup %1786  ;;  %v1474_v15 = vadd.f32 %v1785_v10, %v1466_v40 }
 0x17c   : > { %v1438_v16 = vadd.f32 %v1787_v13, %v1430_v11  ;;  %v1789_v17 = vpop.eup %1788 }
 0x17d   : > { %v1791_v58 = vpop.eup %1790 }
 0x17e   : > { %v1446_v18 = vadd.f32 %v1789_v17, %v1438_v16  ;;  %v1793_v2 = vpop.eup %1792 }
 0x17f   : > { %v1795_v22 = vpop.eup %1794  ;;  %v1482_v30 = vadd.f32 %v1793_v2, %v1474_v15 }
 0x180   : > { %v1454_v19 = vadd.f32 %v1791_v58, %v1446_v18  ;;  %v1797_v31 = vpop.eup %1796 }
 0x181   : > { %1800 = vlog2.f32 %v1482_v30  ;;  %v1799_v36 = vpop.eup %1798 }
 0x182   : > { %v1462_v20 = vadd.f32 %v1795_v22, %v1454_v19 }
 0x184   : > { %v1470_v33 = vadd.f32 %v1797_v31, %v1462_v20 }
 0x186   : > { %v1478_v35 = vadd.f32 %v1799_v36, %v1470_v33 }
 0x188   : > { %1802 = vlog2.f32 %v1478_v35 }
 0x18b   : > { %v1801_v37 = vpop.eup %1800 }
 0x18c   : > { %v1484_v0 = vmul.f32 0.6931472, %v1801_v37 }
 0x18e   : > { %v1485_v38 = vadd.f32 %v1484_v0, %v2300_v25 }
 0x192   : > { %v1803_v39 = vpop.eup %1802 }
 0x193   : > { %v1487_v34 = vmul.f32 0.6931472, %v1803_v39 }
 0x195   : > { %v1488_v48 = vadd.f32 %v1487_v34, %v2319_v12 }
 0x197   : > { %v1489_v27 = vsub.f32 %v1485_v38, %v1488_v48 }
 0x199   : > { %1490 = vst.msk [vmem:[%s244_s10] sm:$0xff] %vm1325_vm1, %v1489_v27 }
 0x19a PF: > { %p15_p8 = scmp.ge.s32.totalorder %s1976_s25, 4   ;;  %s2369_s15 = smov %s1892_s16 }
 0x19b   : > { %s2370_s16 = smov %s1896_s17  ;;  %s2371_s17 = smov %s2002_s14 }
 0x19c   : > { %s2372_s18 = smov %s1976_s25  ;;  %17 = sbr.rel (!%p15_p8) target bundleno = 4 (0x4), region = 83 }
 0x1a3   :  { %1510 = vsyncpa [#allocation3], 1 }
 0x1a4   :  { %1512 = vsyncpa [#allocation3 + $0x1], 1 }
 0x1a5   :  { %1513 = vsyncpa [#allocation5], 1 }

// kernel: tpu_custom_call.1
= control target key start
LH: loop header
LB: loop body
LE: loop exit
PB: predicated region body
PF: predicated region fallthrough
CT: control target
= control target key end

     0   :  { %9 = vsyncpa [#allocation3], 0  ;;  %s2353_s0 = inlined_call_operand.hbm [shape: f32[16,32], index: 0, kind: input, shape index: {}]   ;;  %s2354_s1 = inlined_call_operand.vmem [shape: f32[16,4], index: 1, kind: input, shape index: {}]   ;;  %s2355_s2 = inlined_call_operand.hbm [shape: f32[32,3072], index: 2, kind: input, shape index: {}]   ;;  %s2356_s3 = inlined_call_operand.vmem [shape: f32[1,3072], index: 3, kind: input, shape index: {}]   ;;  %s2357_s4 = inlined_call_operand.vmem [shape: f32[16,4], index: 4, kind: output, shape index: {}]  }
   0x1   :  { %11 = vsyncpa [#allocation3 + $0x1], 0 }
   0x2   :  { %12 = vsyncpa [#allocation5], 0  ;;  %s1932_s15 = smov 0   ;;  %s1934_s16 = smov 0  }
   0x3   :  { %s1936_s17 = smov 0   ;;  %s1938_s18 = smov 0  }
   0x4 LB: > { %s1951_s19 = sadd.s32 4294967295, %s1900_s18   ;;  %p38_p0 = scmp.ne.s32.totalorder %s1892_s16, %s1888_s15  ;;  %s1900_s18 = sphi %s1938_s18, %s2372_s18   ;;  %s1896_s17 = sphi %s1936_s17, %s2371_s17   ;;  %s1892_s16 = sphi %s1934_s16, %s2370_s16   ;;  %s1888_s15 = sphi %s1932_s15, %s2369_s15  }
   0x5   : > { %p2358_p1 = scmp.eq.s32.totalorder %s1951_s19, 0  ;;  %p1579_p2 = scmp.ge.s32.totalorder %s1900_s18, 1 }
   0x6   : > { %p143_p3 = scmp.lt.s32.totalorder %s1900_s18, 3  ;;  %s1902_s22 = smov [#allocation4]  }
   0x7   : > { %p1959_p4 = por %p2358_p1, %p38_p0  ;;  %s155_s23 = sshll.u32 %s1902_s22, 4  ;;  %s156_s23 = int_to_ptr.vmem [resolvable:$true] %s155_s23 }
   0x8   : > { %p1963_p5 = pnand %p1579_p2, %p143_p3  ;;  %s1976_s25 = sadd.s32 1, %s1900_s18  }
   0x9   : > { %s2361_s20 = scalar_select %p1959_p4, 1, 0 }
   0xa   : > { %s2362_s21 = scalar_select %p1963_p5, 1, 0 }
   0xb   : > { %p1705_p6 = pneg %p1963_p5  ;;  %s25_s26 = sadd.s32 1, %s1896_s17 }
   0xc   : > { %s22_s27 = ssub.s32 %s1900_s18, %s1976_s25  ;;  %s1804_s30 = scalar_lea.hbm %s2355_s2, 12288 }
   0xd   : > { %p1971_p7 = pnand %p1705_p6, %p2358_p1  ;;  %p1805_p8 = scmp.ne.s32.totalorder %s2355_s2, %s1804_s30 }
   0xe   : > { %p1811_p12 = scmp.lt.u32.totalorder %s1804_s30, %s2355_s2 }
   0xf   : > { %p1806_p9 = pneg %p1971_p7 }
  0x11   : > { %p1807_p10 = pnand %p1806_p9, %p1805_p8 }
  0x13   : > { %p1808_p11 = pneg %p1807_p10 }
  0x15   : > { %p1813_p13 = pnand %p1811_p12, %p1808_p11 }
  0x17   : > { %1816 = shalt.err (!%p1813_p13)
}
  0x18   : > { %s1817_s9 = scalar_lea.vmem %s156_s23, 12288  ;;  %p1825_p6 = scmp.lt.s32.totalorder %s156_s23, %s156_s23 }
  0x19   : > { %p1818_p0 = scmp.ne.s32.totalorder %s156_s23, %s1817_s9  ;;  %p1826_p1 = scmp.lt.s32.totalorder %s1817_s9, %s1817_s9 }
  0x1b   : > { %p1820_p2 = pnand %p1818_p0, %p1806_p9  ;;  %p1827_p4 = por %p1826_p1, %p1825_p6 }
  0x1d   : > { %p1821_p3 = pneg %p1820_p2 }
  0x1f   : > { %p1828_p5 = pnand %p1827_p4, %p1821_p3 }
  0x21   : > { %1831 = shalt.err (!%p1828_p5)
}
  0x22   : > { %s1903_s10 = smov 3072   ;;  %s1904_s11 = smov 192  }
  0x23   : > { %1708 = dma.hbm_to_vmem [thread:$0]  (!%p1971_p7), %s2355_s2, 12288, %s156_s23, [#allocation5], %s1903_s10, %s1903_s10, %s1904_s11  }
  0x24   : > { %p23_p8 = scmp.eq.s32.totalorder %s22_s27, 0  ;;  %p32_p9 = scmp.ne.s32.totalorder %s1896_s17, %s1892_s16 }
  0x25   : > { %p33_p1 = scmp.eq.s32.totalorder %s1900_s18, 0  ;;  %p1714_p4 = scmp.lt.s32.totalorder %s1900_s18, 2 }
  0x26   : > { %s2002_s14 = scalar_select %p23_p8, %s1896_s17, %s25_s26  }
  0x27   : > { %p34_p5 = por %p33_p1, %p32_p9  ;;  %s172_s15 = sand.u32 1, %s1896_s17  }
  0x28   : > { %s1582_s22 = sshll.u32 %s172_s15, 3  ;;  %s1583_s28 = sshll.u32 %s1900_s18, 7 }
  0x29   : > { %s2009_s5 = scalar_lea.hbm %s2353_s0, %s1583_s28  ;;  %s176_s23 = scalar_lea.vmem [#allocation2], %s1582_s22 }
  0x2a   : > { %s183_s24 = sshll.u32 %s176_s23, 4  ;;  %p2013_p7 = pnand %p1714_p4, %p34_p5  ;;  %s2011_s24 = int_to_ptr.vmem [resolvable:$true] %s183_s24 }
  0x2b   : > { %s173_s18 = scalar_lea.sflag [#allocation3], %s172_s15  ;;  %s1832_s27 = scalar_lea.hbm %s2009_s5, 128 }
  0x2c   : > { %p1833_p10 = scmp.ne.s32.totalorder %s2009_s5, %s1832_s27  ;;  %p1834_p11 = pneg %p2013_p7 }
  0x2d   : > { %s1837_s8 = scalar_lea.hbm %s2353_s0, 256  ;;  %p1838_p0 = scmp.lt.u32.totalorder %s2009_s5, %s2353_s0 }
  0x2e   : > { %p1835_p12 = pnand %p1834_p11, %p1833_p10  ;;  %p1839_p2 = scmp.lt.u32.totalorder %s1837_s8, %s1832_s27 }
  0x2f   : > { %p1841_p6 = scmp.lt.u32.totalorder %s1832_s27, %s2009_s5 }
  0x30   : > { %p1836_p13 = pneg %p1835_p12  ;;  %p1840_p3 = por %p1839_p2, %p1838_p0 }
  0x32   : > { %p1842_p8 = por %p1841_p6, %p1840_p3 }
  0x34   : > { %p1843_p9 = pnand %p1842_p8, %p1836_p13 }
  0x36   : > { %1846 = shalt.err (!%p1843_p9)
}
  0x37   : > { %s1847_s11 = scalar_lea.vmem %s2011_s24, 128  ;;  %s1905_s12 = smov [#allocation2]  }
  0x38   : > { %p1848_p1 = scmp.ne.s32.totalorder %s2011_s24, %s1847_s11  ;;  %s1852_s13 = sshll.u32 %s1905_s12, 4  ;;  %s1853_s13 = int_to_ptr.vmem [resolvable:$false] %s1852_s13 }
  0x39   : > { %s1854_s15 = scalar_lea.vmem %s1853_s13, 256  ;;  %p1855_p10 = scmp.lt.s32.totalorder %s2011_s24, %s1853_s13 }
  0x3a   : > { %p1850_p4 = pnand %p1848_p1, %p1834_p11  ;;  %p1856_p12 = scmp.lt.s32.totalorder %s1854_s15, %s1847_s11 }
  0x3c   : > { %p1851_p5 = pneg %p1850_p4  ;;  %p1857_p0 = por %p1856_p12, %p1855_p10 }
  0x3e   : > { %p1858_p2 = pnand %p1857_p0, %p1851_p5 }
  0x40   : > { %1861 = shalt.err (!%p1858_p2)
}
  0x41   : > { %1712 = dma.hbm_to_vmem [thread:$0]  (!%p2013_p7), %s2009_s5, 128, %s2011_s24, %s173_s18  }
  0x42   : > { %p2365_p13 = scmp.ne.s32.totalorder %s2362_s21, 0 }
  0x43   : > { %s201_s22 = sand.u32 (!%p2365_p13), 1, %s1892_s16   ;;  %p2366_p11 = scmp.ne.s32.totalorder (!%p2365_p13), %s2361_s20, 0 }
  0x44   : > { %199 = sbr.rel (%p2365_p13) target bundleno = 410 (0x19a), region = 36  ;;  %s2045_s28 = sshll.u32 (!%p2365_p13), %s201_s22, 3 }
  0x45   : > { %s202_s29 = scalar_lea.sflag (!%p2365_p13), [#allocation3], %s201_s22  ;;  %s205_s30 = scalar_lea.vmem (!%p2365_p13), [#allocation2], %s2045_s28 }
  0x4b   : > { %1879 = dma.done.wait (%p2366_p11), %s202_s29, 128  }
  0x4c   : > { %1881 = vsyncadd (%p2366_p11), %s202_s29, 4294967168  ;;  %p2367_p3 = scmp.eq.s32.totalorder %s1951_s19, 0 }
  0x4e   : > { %1883 = dma.done.wait (%p2367_p3), [#allocation5], 12288   ;;  %p2368_p7 = pmov %p2367_p3 }
  0x4f   : > { %v1906_v0 = vmov 0.0   ;;  %v247_v1 = vld [vmem:[#allocation4 + $0x8] sm:$0xff]  ;;  %v249_v3 = vld [vmem:[#allocation4 + $0x18] sm:$0xff]  ;;  %v246_v6 = vld [vmem:[#allocation4] sm:$0xff]  ;;  %vm468_vm0 = vcmask 261120   ;;  %p237_p6 = scmp.lt.s32.totalorder %s1951_s19, 1 }
  0x50   : > { %1885 = vsyncadd (%p2368_p7), [#allocation5], 4294955008  ;;  %536 = vmatprep.mubr.f32.mxu0 %v1906_v0  ;;  %607 = vmatprep.mubr.f32.mxu1 %v1906_v0  ;;  %v271_v2 = vld [vmem:[#allocation4 + $0xc8] sm:$0xff]  ;;  %v273_v5 = vld [vmem:[#allocation4 + $0xd8] sm:$0xff]  ;;  %vm1325_vm1 = vcmask 31744  }
  0x51   : > { %v1603_v4 = vpack.c.bf16 %v271_v2, %v247_v1  ;;  %v270_v7 = vld [vmem:[#allocation4 + $0xc0] sm:$0xff]  ;;  %v1611_v8 = vpack.c.bf16 %v273_v5, %v249_v3  ;;  %v248_v10 = vld [vmem:[#allocation4 + $0x10] sm:$0xff]  ;;  %v295_v12 = vld [vmem:[#allocation4 + $0x188] sm:$0xff]  ;;  %s2374_s19 = smov (!%p237_p6, %s1951_s19), 1 }
  0x52   : > { %v1605_v9 = vpack.c.bf16 %v270_v7, %v246_v6  ;;  %v272_v11 = vld [vmem:[#allocation4 + $0xd0] sm:$0xff]  ;;  %v319_v14 = vld [vmem:[#allocation4 + $0x248] sm:$0xff]  ;;  %v297_v15 = vld [vmem:[#allocation4 + $0x198] sm:$0xff]  ;;  %s1587_s20 = sshll.u32 %s2374_s19, 3 }
  0x53   : > { %1604 = vmatprep.subr.bf16.mxu0 %v1603_v4  ;;  %v1613_v13 = vpack.c.bf16 %v272_v11, %v248_v10  ;;  %v321_v16 = vld [vmem:[#allocation4 + $0x258] sm:$0xff]  ;;  %1612 = vmatprep.subr.bf16.mxu1 %v1611_v8  ;;  %v1607_v17 = vpack.c.bf16 %v319_v14, %v295_v12  ;;  %v294_v19 = vld [vmem:[#allocation4 + $0x180] sm:$0xff]  ;;  %v296_v21 = vld [vmem:[#allocation4 + $0x190] sm:$0xff]  ;;  %s240_s26 = scalar_lea.vmem %s2354_s1, %s1587_s20  ;;  %s244_s10 = scalar_lea.vmem %s2357_s4, %s1587_s20 }
  0x54   : > { %1606 = vmatpush1.bf16.msra.mxu0 %v1605_v9  ;;  %v1615_v18 = vpack.c.bf16 %v321_v16, %v297_v15  ;;  %v318_v20 = vld [vmem:[#allocation4 + $0x240] sm:$0xff]  ;;  %v320_v23 = vld [vmem:[#allocation4 + $0x250] sm:$0xff]  ;;  %v251_v24 = vld [vmem:[#allocation4 + $0x28] sm:$0xff] }
  0x55   : > { %1614 = vmatpush1.bf16.msra.mxu1 %v1613_v13  ;;  %v1609_v22 = vpack.c.bf16 %v318_v20, %v294_v19  ;;  %1608 = vmatprep.subr.bf16.mxu0 %v1607_v17  ;;  %v1617_v25 = vpack.c.bf16 %v320_v23, %v296_v21  ;;  %v2060_v26 = vld [vmem:[%s205_s30] sm:$0xff]  ;;  %v275_v27 = vld [vmem:[#allocation4 + $0xe8] sm:$0xff]  ;;  %v250_v32 = vld [vmem:[#allocation4 + $0x20] sm:$0xff] }
  0x56   : > { %1616 = vmatprep.subr.bf16.mxu1 %v1615_v18  ;;  %v253_v28 = vld [vmem:[#allocation4 + $0x38] sm:$0xff]  ;;  %v1619_v30 = vpack.c.bf16 %v275_v27, %v251_v24  ;;  %v274_v33 = vld [vmem:[#allocation4 + $0xe0] sm:$0xff]  ;;  %v252_v34 = vld [vmem:[#allocation4 + $0x30] sm:$0xff] }
  0x57   : > { %v277_v29 = vld [vmem:[#allocation4 + $0xf8] sm:$0xff]  ;;  %v1621_v35 = vpack.c.bf16 %v274_v33, %v250_v32  ;;  %v276_v36 = vld [vmem:[#allocation4 + $0xf0] sm:$0xff]  ;;  %v299_v37 = vld [vmem:[#allocation4 + $0x1a8] sm:$0xff] }
  0x58   : > { %v1627_v31 = vpack.c.bf16 %v277_v29, %v253_v28  ;;  %1610 = vmatpush1.bf16.msra.mxu0 %v1609_v22  ;;  %v323_v38 = vld [vmem:[#allocation4 + $0x268] sm:$0xff]  ;;  %v1629_v39 = vpack.c.bf16 %v276_v36, %v252_v34  ;;  %v301_v41 = vld [vmem:[#allocation4 + $0x1b8] sm:$0xff]  ;;  %v298_v43 = vld [vmem:[#allocation4 + $0x1a0] sm:$0xff] }
  0x59   : > { %1618 = vmatpush1.bf16.msra.mxu1 %v1617_v25  ;;  %1620 = vmatprep.subr.bf16.mxu0 %v1619_v30  ;;  %v1623_v40 = vpack.c.bf16 %v323_v38, %v299_v37  ;;  %v325_v42 = vld [vmem:[#allocation4 + $0x278] sm:$0xff]  ;;  %v322_v45 = vld [vmem:[#allocation4 + $0x260] sm:$0xff]  ;;  %v300_v46 = vld [vmem:[#allocation4 + $0x1b0] sm:$0xff] }
  0x5a   : > { %1628 = vmatprep.subr.bf16.mxu1 %v1627_v31  ;;  %v1631_v44 = vpack.c.bf16 %v325_v42, %v301_v41  ;;  %v324_v47 = vld [vmem:[#allocation4 + $0x270] sm:$0xff]  ;;  %v255_v48 = vld [vmem:[#allocation4 + $0x48] sm:$0xff]  ;;  %v257_v50 = vld [vmem:[#allocation4 + $0x58] sm:$0xff]  ;;  %v1625_v51 = vpack.c.bf16 %v322_v45, %v298_v43 }
  0x5b   : > { %1589 = vmatmul.mubr.msk.f32.vlgmr.msra.gmra.mrb[0].mxu0 %vm468_vm0, %v2060_v26  ;;  %v279_v49 = vld [vmem:[#allocation4 + $0x108] sm:$0xff]  ;;  %v281_v52 = vld [vmem:[#allocation4 + $0x118] sm:$0xff]  ;;  %v1633_v53 = vpack.c.bf16 %v324_v47, %v300_v46  ;;  %v254_v55 = vld [vmem:[#allocation4 + $0x40] sm:$0xff] }
  0x5c   : > { %1590 = vmatmul.mubr.msk.f32.vlgmr.msra.gmra.mrb[0].mxu1 %vm468_vm0, %v2060_v26  ;;  %1622 = vmatpush1.bf16.msra.mxu0 %v1621_v35  ;;  %v1635_v54 = vpack.c.bf16 %v279_v49, %v255_v48  ;;  %v278_v56 = vld [vmem:[#allocation4 + $0x100] sm:$0xff]  ;;  %v256_v57 = vld [vmem:[#allocation4 + $0x50] sm:$0xff]  ;;  %v1643_v58 = vpack.c.bf16 %v281_v52, %v257_v50  ;;  %v303_v60 = vld [vmem:[#allocation4 + $0x1c8] sm:$0xff] }
  0x5d   : > { %1630 = vmatpush1.bf16.msra.mxu1 %v1629_v39  ;;  %1624 = vmatprep.subr.bf16.mxu0 %v1623_v40  ;;  %v280_v59 = vld [vmem:[#allocation4 + $0x110] sm:$0xff]  ;;  %v327_v61 = vld [vmem:[#allocation4 + $0x288] sm:$0xff]  ;;  %v305_v62 = vld [vmem:[#allocation4 + $0x1d8] sm:$0xff]  ;;  %v1637_v1 = vpack.c.bf16 %v278_v56, %v254_v55 }
  0x5e   : > { %1632 = vmatprep.subr.bf16.mxu1 %v1631_v44  ;;  %678 = vmatprep.mubr.f32.mxu0 %v1906_v0  ;;  %v329_v63 = vld [vmem:[#allocation4 + $0x298] sm:$0xff]  ;;  %v1645_v2 = vpack.c.bf16 %v280_v59, %v256_v57  ;;  %v1639_v3 = vpack.c.bf16 %v327_v61, %v303_v60  ;;  %v302_v4 = vld [vmem:[#allocation4 + $0x1c0] sm:$0xff]  ;;  %v304_v6 = vld [vmem:[#allocation4 + $0x1d0] sm:$0xff] }
  0x5f   : > { %749 = vmatprep.mubr.f32.mxu1 %v1906_v0  ;;  %v326_v5 = vld [vmem:[#allocation4 + $0x280] sm:$0xff]  ;;  %v1647_v7 = vpack.c.bf16 %v329_v63, %v305_v62  ;;  %v328_v8 = vld [vmem:[#allocation4 + $0x290] sm:$0xff]  ;;  %v259_v9 = vld [vmem:[#allocation4 + $0x68] sm:$0xff] }
  0x60   : > { %1626 = vmatpush1.bf16.msra.mxu0 %v1625_v51  ;;  %v283_v10 = vld [vmem:[#allocation4 + $0x128] sm:$0xff]  ;;  %v261_v11 = vld [vmem:[#allocation4 + $0x78] sm:$0xff]  ;;  %v1641_v13 = vpack.c.bf16 %v326_v5, %v302_v4  ;;  %v1649_v14 = vpack.c.bf16 %v328_v8, %v304_v6  ;;  %v258_v16 = vld [vmem:[#allocation4 + $0x60] sm:$0xff] }
  0x61   : > { %1634 = vmatpush1.bf16.msra.mxu1 %v1633_v53  ;;  %1636 = vmatprep.subr.bf16.mxu0 %v1635_v54  ;;  %v285_v12 = vld [vmem:[#allocation4 + $0x138] sm:$0xff]  ;;  %v1651_v15 = vpack.c.bf16 %v283_v10, %v259_v9  ;;  %v282_v17 = vld [vmem:[#allocation4 + $0x120] sm:$0xff]  ;;  %v260_v18 = vld [vmem:[#allocation4 + $0x70] sm:$0xff] }
  0x62   : > { %1644 = vmatprep.subr.bf16.mxu1 %v1643_v58  ;;  %v1659_v19 = vpack.c.bf16 %v285_v12, %v261_v11  ;;  %v284_v20 = vld [vmem:[#allocation4 + $0x130] sm:$0xff]  ;;  %v307_v21 = vld [vmem:[#allocation4 + $0x1e8] sm:$0xff]  ;;  %v309_v23 = vld [vmem:[#allocation4 + $0x1f8] sm:$0xff]  ;;  %v1653_v25 = vpack.c.bf16 %v282_v17, %v258_v16 }
  0x63   : > { %1591 = vmatmul.mubr.msk.f32.vlgmr.msra.gmra.mrb[2].mxu0 %vm468_vm0, %v2060_v26  ;;  %v331_v22 = vld [vmem:[#allocation4 + $0x2a8] sm:$0xff]  ;;  %v333_v24 = vld [vmem:[#allocation4 + $0x2b8] sm:$0xff]  ;;  %v1661_v27 = vpack.c.bf16 %v284_v20, %v260_v18  ;;  %v306_v29 = vld [vmem:[#allocation4 + $0x1e0] sm:$0xff] }
  0x64   : > { %1592 = vmatmul.mubr.msk.f32.vlgmr.msra.gmra.mrb[2].mxu1 %vm468_vm0, %v2060_v26  ;;  %1638 = vmatpush1.bf16.msra.mxu0 %v1637_v1  ;;  %v1655_v28 = vpack.c.bf16 %v331_v22, %v307_v21  ;;  %v330_v30 = vld [vmem:[#allocation4 + $0x2a0] sm:$0xff]  ;;  %v308_v31 = vld [vmem:[#allocation4 + $0x1f0] sm:$0xff]  ;;  %v1663_v32 = vpack.c.bf16 %v333_v24, %v309_v23  ;;  %v263_v34 = vld [vmem:[#allocation4 + $0x88] sm:$0xff] }
  0x65   : > { %1646 = vmatpush1.bf16.msra.mxu1 %v1645_v2  ;;  %1640 = vmatprep.subr.bf16.mxu0 %v1639_v3  ;;  %v332_v33 = vld [vmem:[#allocation4 + $0x2b0] sm:$0xff]  ;;  %v287_v35 = vld [vmem:[#allocation4 + $0x148] sm:$0xff]  ;;  %v265_v36 = vld [vmem:[#allocation4 + $0x98] sm:$0xff]  ;;  %v1657_v38 = vpack.c.bf16 %v330_v30, %v306_v29 }
  0x66   : > { %1648 = vmatprep.subr.bf16.mxu1 %v1647_v7  ;;  %820 = vmatprep.mubr.f32.mxu0 %v1906_v0  ;;  %v289_v37 = vld [vmem:[#allocation4 + $0x158] sm:$0xff]  ;;  %v1665_v39 = vpack.c.bf16 %v332_v33, %v308_v31  ;;  %v1667_v40 = vpack.c.bf16 %v287_v35, %v263_v34  ;;  %v262_v41 = vld [vmem:[#allocation4 + $0x80] sm:$0xff]  ;;  %v311_v43 = vld [vmem:[#allocation4 + $0x208] sm:$0xff] }
  0x67   : > { %891 = vmatprep.mubr.f32.mxu1 %v1906_v0  ;;  %v286_v42 = vld [vmem:[#allocation4 + $0x140] sm:$0xff]  ;;  %v335_v44 = vld [vmem:[#allocation4 + $0x2c8] sm:$0xff]  ;;  %v1675_v45 = vpack.c.bf16 %v289_v37, %v265_v36  ;;  %v264_v46 = vld [vmem:[#allocation4 + $0x90] sm:$0xff] }
  0x68   : > { %1642 = vmatpush1.bf16.msra.mxu0 %v1641_v13  ;;  %v288_v47 = vld [vmem:[#allocation4 + $0x150] sm:$0xff]  ;;  %v313_v48 = vld [vmem:[#allocation4 + $0x218] sm:$0xff]  ;;  %v1669_v50 = vpack.c.bf16 %v286_v42, %v262_v41  ;;  %v1671_v51 = vpack.c.bf16 %v335_v44, %v311_v43  ;;  %v310_v52 = vld [vmem:[#allocation4 + $0x200] sm:$0xff] }
  0x69   : > { %1650 = vmatpush1.bf16.msra.mxu1 %v1649_v14  ;;  %1652 = vmatprep.subr.bf16.mxu0 %v1651_v15  ;;  %v337_v49 = vld [vmem:[#allocation4 + $0x2d8] sm:$0xff]  ;;  %v334_v53 = vld [vmem:[#allocation4 + $0x2c0] sm:$0xff]  ;;  %v1677_v54 = vpack.c.bf16 %v288_v47, %v264_v46  ;;  %v267_v55 = vld [vmem:[#allocation4 + $0xa8] sm:$0xff] }
  0x6a   : > { %1660 = vmatprep.subr.bf16.mxu1 %v1659_v19  ;;  %v1679_v56 = vpack.c.bf16 %v337_v49, %v313_v48  ;;  %v291_v57 = vld [vmem:[#allocation4 + $0x168] sm:$0xff]  ;;  %v312_v58 = vld [vmem:[#allocation4 + $0x210] sm:$0xff]  ;;  %v269_v60 = vld [vmem:[#allocation4 + $0xb8] sm:$0xff]  ;;  %v1673_v62 = vpack.c.bf16 %v334_v53, %v310_v52 }
  0x6b   : > { %1593 = vmatmul.mubr.msk.f32.vlgmr.msra.gmra.mrb[4].mxu0 %vm468_vm0, %v2060_v26  ;;  %v336_v59 = vld [vmem:[#allocation4 + $0x2d0] sm:$0xff]  ;;  %v293_v61 = vld [vmem:[#allocation4 + $0x178] sm:$0xff]  ;;  %v1683_v63 = vpack.c.bf16 %v291_v57, %v267_v55  ;;  %v266_v2 = vld [vmem:[#allocation4 + $0xa0] sm:$0xff] }
  0x6c   : > { %1594 = vmatmul.mubr.msk.f32.vlgmr.msra.gmra.mrb[4].mxu1 %vm468_vm0, %v2060_v26  ;;  %1654 = vmatpush1.bf16.msra.mxu0 %v1653_v25  ;;  %v1681_v1 = vpack.c.bf16 %v336_v59, %v312_v58  ;;  %v290_v3 = vld [vmem:[#allocation4 + $0x160] sm:$0xff]  ;;  %v315_v4 = vld [vmem:[#allocation4 + $0x228] sm:$0xff]  ;;  %v1691_v6 = vpack.c.bf16 %v293_v61, %v269_v60  ;;  %v268_v7 = vld [vmem:[#allocation4 + $0xb0] sm:$0xff]  ;;  %v348_v25 = vlaneseq }
  0x6d   : > { %1662 = vmatpush1.bf16.msra.mxu1 %v1661_v27  ;;  %1656 = vmatprep.subr.bf16.mxu0 %v1655_v28  ;;  %v339_v5 = vld [vmem:[#allocation4 + $0x2e8] sm:$0xff]  ;;  %v292_v8 = vld [vmem:[#allocation4 + $0x170] sm:$0xff]  ;;  %v317_v9 = vld [vmem:[#allocation4 + $0x238] sm:$0xff]  ;;  %v1685_v11 = vpack.c.bf16 %v290_v3, %v266_v2 }
  0x6e   : > { %1664 = vmatprep.subr.bf16.mxu1 %v1663_v32  ;;  %962 = vmatprep.mubr.f32.mxu0 %v1906_v0  ;;  %v341_v10 = vld [vmem:[#allocation4 + $0x2f8] sm:$0xff]  ;;  %v1687_v12 = vpack.c.bf16 %v339_v5, %v315_v4  ;;  %v314_v13 = vld [vmem:[#allocation4 + $0x220] sm:$0xff]  ;;  %v1693_v15 = vpack.c.bf16 %v292_v8, %v268_v7  ;;  %v316_v17 = vld [vmem:[#allocation4 + $0x230] sm:$0xff] }
  0x6f   : > { %1033 = vmatprep.mubr.f32.mxu1 %v1906_v0  ;;  %v338_v14 = vld [vmem:[#allocation4 + $0x2e0] sm:$0xff]  ;;  %v1695_v16 = vpack.c.bf16 %v341_v10, %v317_v9  ;;  %v340_v18 = vld [vmem:[#allocation4 + $0x2f0] sm:$0xff]  ;;  %v2120_v30 = vld [vmem:[%s2356_s3 + $0x8] sm:$0xff] }
  0x70   : > { %1658 = vmatpush1.bf16.msra.mxu0 %v1657_v38  ;;  %v1689_v19 = vpack.c.bf16 %v338_v14, %v314_v13  ;;  %v1697_v20 = vpack.c.bf16 %v340_v18, %v316_v17  ;;  %v2140_v36 = vld [vmem:[%s2356_s3] sm:$0xff]  ;;  %v2186_v2 = vld [vmem:[%s2356_s3 + $0x10] sm:$0xff] }
  0x71   : > { %1666 = vmatpush1.bf16.msra.mxu1 %v1665_v39  ;;  %1668 = vmatprep.subr.bf16.mxu0 %v1667_v40  ;;  %v1324_v39 = vld [vmem:[%s240_s26] sm:$0xff] }
  0x72   : > { %1676 = vmatprep.subr.bf16.mxu1 %v1675_v45  ;;  %v2157_v48 = vsel %vm1325_vm1, %v1324_v39, 0.0 }
  0x73   : > { %1595 = vmatmul.mubr.msk.f32.vlgmr.msra.gmra.mrb[6].mxu0 %vm468_vm0, %v2060_v26 }
  0x74   : > { %1596 = vmatmul.mubr.msk.f32.vlgmr.msra.gmra.mrb[6].mxu1 %vm468_vm0, %v2060_v26  ;;  %1670 = vmatpush1.bf16.msra.mxu0 %v1669_v50 }
  0x75   : > { %1672 = vmatprep.subr.bf16.mxu0 %v1671_v51  ;;  %1678 = vmatpush1.bf16.msra.mxu1 %v1677_v54 }
  0x76   : > { %1104 = vmatprep.mubr.f32.mxu0 %v1906_v0  ;;  %1680 = vmatprep.subr.bf16.mxu1 %v1679_v56 }
  0x77   : > { %1175 = vmatprep.mubr.f32.mxu1 %v1906_v0 }
  0x78   : > { %1674 = vmatpush1.bf16.msra.mxu0 %v1673_v62 }
  0x79   : > { %1684 = vmatprep.subr.bf16.mxu0 %v1683_v63  ;;  %1682 = vmatpush1.bf16.msra.mxu1 %v1681_v1 }
  0x7a   : > { %1692 = vmatprep.subr.bf16.mxu1 %v1691_v6 }
  0x7b   : > { %1597 = vmatmul.mubr.msk.f32.vlgmr.msra.gmra.mrb[8].mxu0 %vm468_vm0, %v2060_v26 }
  0x7c   : > { %1686 = vmatpush1.bf16.msra.mxu0 %v1685_v11  ;;  %1598 = vmatmul.mubr.msk.f32.vlgmr.msra.gmra.mrb[8].mxu1 %vm468_vm0, %v2060_v26 }
  0x7d   : > { %1688 = vmatprep.subr.bf16.mxu0 %v1687_v12  ;;  %1694 = vmatpush1.bf16.msra.mxu1 %v1693_v15 }
  0x7e   : > { %1246 = vmatprep.mubr.f32.mxu0 %v1906_v0  ;;  %1696 = vmatprep.subr.bf16.mxu1 %v1695_v16 }
  0x7f   : > { %1317 = vmatprep.mubr.f32.mxu1 %v1906_v0  ;;  %v349_v0 = vshrl.u32 %v348_v25, 7 }
  0x80   : > { %1690 = vmatpush1.bf16.msra.mxu0 %v1689_v19 }
  0x81   : > { %1698 = vmatpush1.bf16.msra.mxu1 %v1697_v20  ;;  %v2122_v31 = vsub.s32 0, %v349_v0  ;;  %v2129_v32 = vsub.s32 1, %v349_v0  ;;  %v2131_v33 = vsub.s32 2, %v349_v0  ;;  %v2133_v34 = vsub.s32 3, %v349_v0 }
  0x82   : > { %v2152_v44 = vsub.s32 4, %v349_v0  ;;  %v2167_v54 = vsub.s32 5, %v349_v0  ;;  %v2172_v57 = vsub.s32 6, %v349_v0  ;;  %v2174_v58 = vsub.s32 7, %v349_v0 }
  0x83   : > { %1599 = vmatmul.mubr.msk.f32.vlgmr.msra.gmra.mrb[10].mxu0 %vm468_vm0, %v2060_v26  ;;  %v383_v35 = vrot.slane %v2120_v30, %v2122_v31  ;;  %v391_v37 = vrot.slane %v2120_v30, %v2131_v33  ;;  %v387_v38 = vrot.slane %v2120_v30, %v2129_v32  ;;  %v395_v40 = vrot.slane %v2120_v30, %v2133_v34 }
  0x84   : > { %1600 = vmatmul.mubr.msk.f32.vlgmr.msra.gmra.mrb[10].mxu1 %vm468_vm0, %v2060_v26  ;;  %v351_v42 = vrot.slane %v2140_v36, %v2122_v31  ;;  %v355_v43 = vrot.slane %v2140_v36, %v2129_v32  ;;  %v359_v49 = vrot.slane %v2140_v36, %v2131_v33  ;;  %v363_v53 = vrot.slane %v2140_v36, %v2133_v34 }
  0x85   : > { %v367_v61 = vrot.slane %v2140_v36, %v2152_v44  ;;  %v399_v1 = vrot.slane %v2120_v30, %v2152_v44  ;;  %v407_v5 = vrot.slane %v2120_v30, %v2172_v57  ;;  %v403_v6 = vrot.slane %v2120_v30, %v2167_v54 }
  0x86   : > { %v371_v7 = vrot.slane %v2140_v36, %v2167_v54  ;;  %v411_v9 = vrot.slane %v2120_v30, %v2174_v58  ;;  %v375_v10 = vrot.slane %v2140_v36, %v2172_v57  ;;  %v379_v11 = vrot.slane %v2140_v36, %v2174_v58 }
  0x87   : > { %v415_v13 = vrot.slane %v2186_v2, %v2122_v31  ;;  %v419_v17 = vrot.slane %v2186_v2, %v2129_v32  ;;  %v423_v18 = vrot.slane %v2186_v2, %v2131_v33  ;;  %v427_v0 = vrot.slane %v2186_v2, %v2133_v34 }
  0x88   : > { %v431_v32 = vrot.slane %v2186_v2, %v2152_v44 }
 0x12e   : > { %v2096_v21 = vpop.f32.mrb[0].mxu0 }
 0x12f   : > { %v2099_v22 = vpop.f32.mrb[1].mxu0  ;;  %v2101_v23 = vpop.f32.mrb[0].mxu1  ;;  %v539_v30 = vadd.f32 %v2096_v21, %v351_v42  ;;  %v435_v21 = vrot.slane %v2186_v2, %v2167_v54 }
 0x130   : > { %v2103_v24 = vpop.f32.mrb[1].mxu1  ;;  %v541_v33 = vadd.f32 %v2099_v22, %v355_v43  ;;  %v610_v36 = vadd.f32 %v2101_v23, %v359_v49  ;;  %v443_v22 = vrot.slane %v2186_v2, %v2174_v58 }
 0x131   : > { %v1327_v49 = vsub.f32 %v2157_v48, %v539_v30 }
 0x136   : > { %v2108_v27 = vpop.f32.mrb[2].mxu0 }
 0x137   : > { %v2111_v28 = vpop.f32.mrb[3].mxu0  ;;  %v2113_v26 = vpop.f32.mrb[2].mxu1  ;;  %v681_v23 = vadd.f32 %v2108_v27, %v367_v61 }
 0x138   : > { %v2115_v29 = vpop.f32.mrb[3].mxu1  ;;  %v2234_v43 = vadd.f32 %v2111_v28, %v371_v7 }
 0x13e   : > { %v822_v41 = vpop.f32.mrb[4].mxu0 }
 0x13f   : > { %v2154_v45 = vadd.f32 %v822_v41, %v383_v35  ;;  %v893_v46 = vpop.f32.mrb[4].mxu1  ;;  %v824_v47 = vpop.f32.mrb[5].mxu0  ;;  %v612_v41 = vadd.f32 %v2103_v24, %v363_v53 }
 0x140   : > { %v2161_v50 = vadd.f32 %v893_v46, %v391_v37  ;;  %v2163_v51 = vadd.f32 %v824_v47, %v387_v38  ;;  %v895_v52 = vpop.f32.mrb[5].mxu1 }
 0x141   : > { %v1328_v55 = vsub.f32 0.0, %v2154_v45  ;;  %v2170_v56 = vadd.f32 %v895_v52, %v395_v40  ;;  %v439_v40 = vrot.slane %v2186_v2, %v2172_v57  ;;  %v1337_v52 = vsub.f32 %v2157_v48, %v541_v33 }
 0x142   : > { %v1348_v59 = vsub.f32 0.0, %v2161_v50  ;;  %v1338_v60 = vsub.f32 0.0, %v2163_v51  ;;  %v1352_v33 = vsub.f32 -0.9189385, %v2161_v50 }
 0x143   : > { %v1329_v62 = vmul.f32 1.442695, %v1328_v55  ;;  %v1358_v63 = vsub.f32 0.0, %v2170_v56  ;;  %v1347_v55 = vsub.f32 %v2157_v48, %v610_v36 }
 0x144   : > { %v1349_v3 = vmul.f32 1.442695, %v1348_v59  ;;  %v1339_v4 = vmul.f32 1.442695, %v1338_v60  ;;  %v752_v59 = vadd.f32 %v2113_v26, %v375_v10  ;;  %v2241_v60 = vadd.f32 %v2115_v29, %v379_v11 }
 0x145   : > { %1752 = vpow2.f32 %v1329_v62  ;;  %v1359_v8 = vmul.f32 1.442695, %v1358_v63  ;;  %v1367_v26 = vsub.f32 %v2157_v48, %v681_v23  ;;  %v1377_v29 = vsub.f32 %v2157_v48, %v2234_v43 }
 0x146   : > { %1754 = vpow2.f32 %v1349_v3  ;;  %v964_v12 = vpop.f32.mrb[6].mxu0 }
 0x147   : > { %1756 = vpow2.f32 %v1339_v4  ;;  %v2202_v14 = vadd.f32 %v964_v12, %v399_v1  ;;  %v1035_v15 = vpop.f32.mrb[6].mxu1  ;;  %v966_v16 = vpop.f32.mrb[7].mxu0 }
 0x148   : > { %1758 = vpow2.f32 %v1359_v8  ;;  %v2208_v19 = vadd.f32 %v1035_v15, %v407_v5  ;;  %v2210_v20 = vadd.f32 %v966_v16, %v403_v6  ;;  %v1037_v25 = vpop.f32.mrb[7].mxu1  ;;  %v1357_v6 = vsub.f32 %v2157_v48, %v612_v41 }
 0x149   : > { %v1368_v31 = vsub.f32 0.0, %v2202_v14  ;;  %v2216_v35 = vadd.f32 %v1037_v25, %v411_v9  ;;  %v1397_v15 = vsub.f32 %v2157_v48, %v2241_v60  ;;  %v1372_v23 = vsub.f32 -0.9189385, %v2202_v14 }
 0x14a   : > { %v1388_v37 = vsub.f32 0.0, %v2208_v19  ;;  %v1378_v38 = vsub.f32 0.0, %v2210_v20 }
 0x14b   : > { %v1369_v39 = vmul.f32 1.442695, %v1368_v31  ;;  %v1398_v34 = vsub.f32 0.0, %v2216_v35 }
 0x14c   : > { %v1389_v42 = vmul.f32 1.442695, %v1388_v37  ;;  %v1379_v46 = vmul.f32 1.442695, %v1378_v38  ;;  %v1342_v37 = vsub.f32 -0.9189385, %v2163_v51 }
 0x14d   : > { %1760 = vpow2.f32 %v1369_v39  ;;  %v1399_v47 = vmul.f32 1.442695, %v1398_v34  ;;  %v1362_v34 = vsub.f32 -0.9189385, %v2170_v56 }
 0x14e   : > { %1762 = vpow2.f32 %v1389_v42  ;;  %v1106_v24 = vpop.f32.mrb[8].mxu0 }
 0x14f   : > { %v1753_v53 = vpop.eup %1752  ;;  %1764 = vpow2.f32 %v1379_v46  ;;  %v2243_v27 = vadd.f32 %v1106_v24, %v415_v13  ;;  %v1108_v28 = vpop.f32.mrb[9].mxu0  ;;  %v1387_v13 = vsub.f32 %v2157_v48, %v752_v59 }
 0x150   : > { %v1177_v61 = vpop.f32.mrb[8].mxu1  ;;  %v1755_v62 = vpop.eup %1754  ;;  %v1331_v63 = vmul.f32 %v1753_v53, %v1327_v49  ;;  %1766 = vpow2.f32 %v1399_v47  ;;  %v2245_v1 = vadd.f32 %v1108_v28, %v419_v17 }
 0x151   : > { %v2247_v3 = vadd.f32 %v1177_v61, %v423_v18  ;;  %v1179_v4 = vpop.f32.mrb[9].mxu1  ;;  %v1757_v5 = vpop.eup %1756  ;;  %v1351_v7 = vmul.f32 %v1755_v62, %v1347_v55  ;;  %v1332_v18 = vsub.f32 -0.9189385, %v2154_v45 }
 0x152   : > { %v1759_v8 = vpop.eup %1758  ;;  %v1333_v9 = vmul.f32 0.5, %v1331_v63  ;;  %v1341_v10 = vmul.f32 %v1757_v5, %v1337_v52  ;;  %v1408_v11 = vmax.f32 %v2243_v27, %v2245_v1  ;;  %v2255_v12 = vadd.f32 %v1179_v4, %v427_v0 }
 0x153   : > { %v1353_v16 = vmul.f32 0.5, %v1351_v7  ;;  %v1361_v17 = vmul.f32 %v1759_v8, %v1357_v6  ;;  %v1392_v8 = vsub.f32 -0.9189385, %v2208_v19 }
 0x154   : > { %v1334_v25 = vmul.f32 %v1333_v9, %v1331_v63  ;;  %v1343_v30 = vmul.f32 0.5, %v1341_v10  ;;  %v1410_v31 = vmax.f32 %v1408_v11, %v2247_v3  ;;  %v1382_v11 = vsub.f32 -0.9189385, %v2210_v20 }
 0x155   : > { %v1354_v36 = vmul.f32 %v1353_v16, %v1351_v7  ;;  %v1363_v0 = vmul.f32 0.5, %v1361_v17 }
 0x156   : > { %v1335_v38 = vsub.f32 %v1332_v18, %v1334_v25  ;;  %v1344_v39 = vmul.f32 %v1343_v30, %v1341_v10  ;;  %v1412_v48 = vmax.f32 %v1410_v31, %v2255_v12  ;;  %v1248_v41 = vpop.f32.mrb[10].mxu0 }
 0x157   : > { %v1761_v42 = vpop.eup %1760  ;;  %v1355_v46 = vsub.f32 %v1352_v33, %v1354_v36  ;;  %v1364_v45 = vmul.f32 %v1363_v0, %v1361_v17  ;;  %v2270_v50 = vadd.f32 %v1248_v41, %v431_v32  ;;  %v1250_v43 = vpop.f32.mrb[11].mxu0  ;;  %v1402_v17 = vsub.f32 -0.9189385, %v2216_v35 }
 0x158   : > { %v1319_v51 = vpop.f32.mrb[10].mxu1  ;;  %v1763_v47 = vpop.eup %1762  ;;  %v1345_v49 = vsub.f32 %v1342_v37, %v1344_v39  ;;  %v1371_v52 = vmul.f32 %v1761_v42, %v1367_v26  ;;  %v2273_v56 = vadd.f32 %v1335_v38, %v2243_v27  ;;  %v1251_v55 = vadd.f32 %v1250_v43, %v435_v21 }
 0x159   : > { %v1321_v24 = vpop.f32.mrb[11].mxu1  ;;  %v1765_v53 = vpop.eup %1764  ;;  %v1365_v14 = vsub.f32 %v1362_v34, %v1364_v45  ;;  %v1391_v59 = vmul.f32 %v1763_v47, %v1387_v13  ;;  %v2279_v44 = vadd.f32 %v1355_v46, %v2247_v3  ;;  %v1414_v32 = vmax.f32 %v1412_v48, %v2270_v50 }
 0x15a   : > { %v1767_v60 = vpop.eup %1766  ;;  %v1373_v28 = vmul.f32 0.5, %v1371_v52  ;;  %v1381_v61 = vmul.f32 %v1765_v53, %v1377_v29  ;;  %v1346_v62 = vadd.f32 %v1345_v49, %v2245_v1  ;;  %v1320_v63 = vadd.f32 %v1319_v51, %v439_v40 }
 0x15b   : > { %v1393_v54 = vmul.f32 0.5, %v1391_v59  ;;  %v1401_v21 = vmul.f32 %v1767_v60, %v1397_v15  ;;  %v2287_v4 = vadd.f32 %v1365_v14, %v2255_v12  ;;  %v1416_v5 = vmax.f32 %v1414_v32, %v1251_v55 }
 0x15c   : > { %v1374_v6 = vmul.f32 %v1373_v28, %v1371_v52  ;;  %v1383_v26 = vmul.f32 0.5, %v1381_v61  ;;  %v1407_v7 = vmax.f32 %v2273_v56, %v1346_v62  ;;  %v2293_v29 = vadd.f32 %v1321_v24, %v443_v22 }
 0x15d   : > { %v1394_v9 = vmul.f32 %v1393_v54, %v1391_v59  ;;  %v1403_v57 = vmul.f32 0.5, %v1401_v21  ;;  %v1418_v40 = vmax.f32 %v1416_v5, %v1320_v63 }
 0x15e   : > { %v1375_v10 = vsub.f32 %v1372_v23, %v1374_v6  ;;  %v1384_v13 = vmul.f32 %v1383_v26, %v1381_v61  ;;  %v1409_v15 = vmax.f32 %v1407_v7, %v2279_v44 }
 0x15f   : > { %v1395_v16 = vsub.f32 %v1392_v8, %v1394_v9  ;;  %v1404_v18 = vmul.f32 %v1403_v57, %v1401_v21  ;;  %v2300_v25 = vmax.f32 %v1418_v40, %v2293_v29 }
 0x160   : > { %v1385_v58 = vsub.f32 %v1382_v11, %v1384_v13  ;;  %v1411_v2 = vmax.f32 %v1409_v15, %v2287_v4  ;;  %v1376_v19 = vadd.f32 %v1375_v10, %v2270_v50 }
 0x161   : > { %v1405_v22 = vsub.f32 %v1402_v17, %v1404_v18  ;;  %v1396_v30 = vadd.f32 %v1395_v16, %v1320_v63  ;;  %v1424_v20 = vsub.f32 %v2243_v27, %v2300_v25  ;;  %v1431_v31 = vsub.f32 %v2245_v1, %v2300_v25 }
 0x162   : > { %v1413_v33 = vmax.f32 %v1411_v2, %v1376_v19  ;;  %v1386_v36 = vadd.f32 %v1385_v58, %v1251_v55  ;;  %v1439_v35 = vsub.f32 %v2247_v3, %v2300_v25  ;;  %v1447_v37 = vsub.f32 %v2255_v12, %v2300_v25 }
 0x163   : > { %v1406_v0 = vadd.f32 %v1405_v22, %v2293_v29  ;;  %v1425_v38 = vmul.f32 1.442695, %v1424_v20  ;;  %v1432_v39 = vmul.f32 1.442695, %v1431_v31  ;;  %v1455_v34 = vsub.f32 %v2270_v50, %v2300_v25 }
 0x164   : > { %v1415_v48 = vmax.f32 %v1413_v33, %v1386_v36  ;;  %v1440_v27 = vmul.f32 1.442695, %v1439_v35  ;;  %v1463_v41 = vsub.f32 %v1251_v55, %v2300_v25  ;;  %v1448_v1 = vmul.f32 1.442695, %v1447_v37 }
 0x165   : > { %1768 = vpow2.f32 %v1425_v38  ;;  %v1471_v42 = vsub.f32 %v1320_v63, %v2300_v25  ;;  %v1479_v3 = vsub.f32 %v2293_v29, %v2300_v25  ;;  %v1456_v45 = vmul.f32 1.442695, %v1455_v34 }
 0x166   : > { %v1417_v46 = vmax.f32 %v1415_v48, %v1396_v30  ;;  %1770 = vpow2.f32 %v1432_v39  ;;  %v1464_v23 = vmul.f32 1.442695, %v1463_v41 }
 0x167   : > { %1772 = vpow2.f32 %v1440_v27  ;;  %v1472_v14 = vmul.f32 1.442695, %v1471_v42  ;;  %v1480_v63 = vmul.f32 1.442695, %v1479_v3 }
 0x168   : > { %v2319_v12 = vmax.f32 %v1417_v46, %v1406_v0  ;;  %1774 = vpow2.f32 %v1448_v1 }
 0x169   : > { %1776 = vpow2.f32 %v1456_v45 }
 0x16a   : > { %v1421_v50 = vsub.f32 %v2273_v56, %v2319_v12  ;;  %v1427_v43 = vsub.f32 %v1346_v62, %v2319_v12  ;;  %v1435_v51 = vsub.f32 %v2279_v44, %v2319_v12  ;;  %v1443_v47 = vsub.f32 %v2287_v4, %v2319_v12 }
 0x16b   : > { %v1451_v49 = vsub.f32 %v1376_v19, %v2319_v12  ;;  %v1459_v52 = vsub.f32 %v1386_v36, %v2319_v12  ;;  %v1467_v55 = vsub.f32 %v1396_v30, %v2319_v12  ;;  %1778 = vpow2.f32 %v1464_v23 }
 0x16c   : > { %v1422_v24 = vmul.f32 1.442695, %v1421_v50  ;;  %v1428_v53 = vmul.f32 1.442695, %v1427_v43  ;;  %v1436_v59 = vmul.f32 1.442695, %v1435_v51  ;;  %v1475_v56 = vsub.f32 %v1406_v0, %v2319_v12 }
 0x16d   : > { %v1444_v44 = vmul.f32 1.442695, %v1443_v47  ;;  %v1452_v61 = vmul.f32 1.442695, %v1451_v49  ;;  %v1460_v4 = vmul.f32 1.442695, %v1459_v52 }
 0x16e   : > { %1780 = vpow2.f32 %v1422_v24  ;;  %v1468_v6 = vmul.f32 1.442695, %v1467_v55  ;;  %v1476_v8 = vmul.f32 1.442695, %v1475_v56 }
 0x16f   : > { %v1769_v32 = vpop.eup %1768  ;;  %1782 = vpow2.f32 %v1428_v53 }
 0x170   : > { %v1771_v60 = vpop.eup %1770  ;;  %1784 = vpow2.f32 %v1472_v14 }
 0x171   : > { %v1434_v28 = vadd.f32 %v1771_v60, %v1769_v32  ;;  %1786 = vpow2.f32 %v1436_v59  ;;  %v1773_v62 = vpop.eup %1772 }
 0x172   : > { %v1775_v54 = vpop.eup %1774  ;;  %1788 = vpow2.f32 %v1444_v44 }
 0x173   : > { %v1442_v21 = vadd.f32 %v1773_v62, %v1434_v28  ;;  %1790 = vpow2.f32 %v1452_v61  ;;  %v1777_v26 = vpop.eup %1776 }
 0x174   : > { %1792 = vpow2.f32 %v1480_v63 }
 0x175   : > { %v1450_v5 = vadd.f32 %v1775_v54, %v1442_v21  ;;  %v1779_v7 = vpop.eup %1778  ;;  %1794 = vpow2.f32 %v1460_v4 }
 0x176   : > { %1796 = vpow2.f32 %v1468_v6 }
 0x177   : > { %v1458_v29 = vadd.f32 %v1777_v26, %v1450_v5  ;;  %1798 = vpow2.f32 %v1476_v8 }
 0x178   : > { %v1781_v9 = vpop.eup %1780 }
 0x179   : > { %v1783_v57 = vpop.eup %1782  ;;  %v1466_v40 = vadd.f32 %v1779_v7, %v1458_v29 }
 0x17a   : > { %v1785_v10 = vpop.eup %1784  ;;  %v1430_v11 = vadd.f32 %v1783_v57, %v1781_v9 }
 0x17b   : > { %v1787_v13 = vpop.eup %1786  ;;  %v1474_v15 = vadd.f32 %v1785_v10, %v1466_v40 }
 0x17c   : > { %v1438_v16 = vadd.f32 %v1787_v13, %v1430_v11  ;;  %v1789_v17 = vpop.eup %1788 }
 0x17d   : > { %v1791_v58 = vpop.eup %1790 }
 0x17e   : > { %v1446_v18 = vadd.f32 %v1789_v17, %v1438_v16  ;;  %v1793_v2 = vpop.eup %1792 }
 0x17f   : > { %v1795_v22 = vpop.eup %1794  ;;  %v1482_v30 = vadd.f32 %v1793_v2, %v1474_v15 }
 0x180   : > { %v1454_v19 = vadd.f32 %v1791_v58, %v1446_v18  ;;  %v1797_v31 = vpop.eup %1796 }
 0x181   : > { %1800 = vlog2.f32 %v1482_v30  ;;  %v1799_v36 = vpop.eup %1798 }
 0x182   : > { %v1462_v20 = vadd.f32 %v1795_v22, %v1454_v19 }
 0x184   : > { %v1470_v33 = vadd.f32 %v1797_v31, %v1462_v20 }
 0x186   : > { %v1478_v35 = vadd.f32 %v1799_v36, %v1470_v33 }
 0x188   : > { %1802 = vlog2.f32 %v1478_v35 }
 0x18b   : > { %v1801_v37 = vpop.eup %1800 }
 0x18c   : > { %v1484_v0 = vmul.f32 0.6931472, %v1801_v37 }
 0x18e   : > { %v1485_v38 = vadd.f32 %v1484_v0, %v2300_v25 }
 0x192   : > { %v1803_v39 = vpop.eup %1802 }
 0x193   : > { %v1487_v34 = vmul.f32 0.6931472, %v1803_v39 }
 0x195   : > { %v1488_v48 = vadd.f32 %v1487_v34, %v2319_v12 }
 0x197   : > { %v1489_v27 = vsub.f32 %v1485_v38, %v1488_v48 }
 0x199   : > { %1490 = vst.msk [vmem:[%s244_s10] sm:$0xff] %vm1325_vm1, %v1489_v27 }
 0x19a PF: > { %p15_p8 = scmp.ge.s32.totalorder %s1976_s25, 4   ;;  %s2369_s15 = smov %s1892_s16 }
 0x19b   : > { %s2370_s16 = smov %s1896_s17  ;;  %s2371_s17 = smov %s2002_s14 }
 0x19c   : > { %s2372_s18 = smov %s1976_s25  ;;  %17 = sbr.rel (!%p15_p8) target bundleno = 4 (0x4), region = 83 }
 0x1a3   :  { %1510 = vsyncpa [#allocation3], 1 }
 0x1a4   :  { %1512 = vsyncpa [#allocation3 + $0x1], 1 }
 0x1a5   :  { %1513 = vsyncpa [#allocation5], 1 }

</bundles_post_ra>
